<compile_context>
chip_gen: v7x
topology: tpu7x:2x2x1
jax: 0.10.0
libtpu: 0.0.40
codegen_flags: <defaults>
</compile_context>

<pallas_src>
import functools

import jax
import jax.numpy as jnp
from jax import lax
from jax.experimental import pallas as pl
from jax.experimental.pallas import tpu as pltpu

_EPS = float(jnp.finfo(jnp.float32).eps)


def _round_up(x: int, m: int) -> int:
    return (x + m - 1) // m * m


# ---------------------------------------------------------------------------
# Glue: window_features (numpy semantics of the reference, plain JAX gather)
# ---------------------------------------------------------------------------
# TODO(synk): building the windowed design in-kernel from the compact (n+lb, f)
# array (lb shifted slices per n-tile) would cut input DMA bytes by ~lookback x;
# kept host-side here because the lane offsets (j*f) are not 128-aligned.
def window_features_jax(X, lookback: int):
    X = jnp.asarray(X, jnp.float32)
    n, f = X.shape
    if lookback <= 1:
        return X
    idx = jnp.arange(lookback)[None, :] + jnp.arange(n - lookback)[:, None]
    # X[i-lb:i].flatten() row-major == reshape of (lb, f) windows
    return X[idx].reshape(n - lookback, lookback * f)


# ---------------------------------------------------------------------------
# Fused Pallas kernel:
#   phase 1 (every grid step): accumulate G = Xaug^T Xaug on the MXU
#   phase 2 (last grid step):  algebraic standardization + Dayal-MacGregor
#                              kernel-PLS recursion on (1, p) rows + predict
# Augmented design Xaug = [X | y | 1(real rows) | 0-pad], so G contains
# X^T X, X^T y, column sums, sum(y), sum(y^2) in one cross-product.
# ---------------------------------------------------------------------------
def _krypto_pls_kernel(xaug_ref, xp_ref, o_ref, g_scr, *,
                       n_real, p_real, n_components):
    step = pl.program_id(0)
    last = pl.num_programs(0) - 1

    @pl.when(step == 0)
    def _init():
        g_scr[...] = jnp.zeros_like(g_scr)

    # ---- accumulate cross-product over this n-tile (full MXU tiles) ---------
    xa = xaug_ref[...]                                          # (tile_n, p_aug)
    g_scr[...] += lax.dot_general(xa, xa, (((0,), (0,)), ((), ())),
                                  preferred_element_type=jnp.float32)

    @pl.when(step == last)
    def _finalize():
        p_aug = g_scr.shape[0]
        G = g_scr[...]                                          # (p_aug, p_aug)
        Xp = xp_ref[...]                                        # (m_pad, p_aug)

        nf = float(n_real)
        inv_n = 1.0 / n_real
        inv_nm1 = 1.0 / (n_real - 1)

        lane = lax.broadcasted_iota(jnp.int32, (1, p_aug), 1)
        featmask = (lane < p_real).astype(jnp.float32)          # (1, p_aug)

        # rows of G that hold the auxiliary cross-terms
        g_row = G[p_real:p_real + 1, :]          # y^T Xaug : [X^T y | yy | sum_y | 0]
        s_row = G[p_real + 1:p_real + 2, :]      # 1^T Xaug : [colsum | sum_y | n | 0]

        ssq_y = g_row[:, p_real:p_real + 1]                     # (1, 1)
        sum_y = s_row[:, p_real:p_real + 1]                     # (1, 1)

        x_mean = s_row * inv_n * featmask                       # (1, p_aug)
        y_mean = sum_y * inv_n                                  # (1, 1)

        # diag(G) for per-column variances (sklearn: std(ddof=1), zeros -> 1)
        ri = lax.broadcasted_iota(jnp.int32, (p_aug, p_aug), 0)
        ci = lax.broadcasted_iota(jnp.int32, (p_aug, p_aug), 1)
        diag = jnp.sum(jnp.where(ri == ci, G, 0.0),
                       axis=0, keepdims=True) * featmask        # (1, p_aug)
        x_var = jnp.maximum((diag - nf * x_mean * x_mean) * inv_nm1, 0.0)
        x_std = jnp.sqrt(x_var)
        x_std = jnp.where(x_std == 0.0, 1.0, x_std)
        inv_x_std = 1.0 / x_std                                 # exact divide

        y_var = jnp.maximum((ssq_y - nf * y_mean * y_mean) * inv_nm1, 0.0)
        y_std = jnp.sqrt(y_var)
        y_std = jnp.where(y_std == 0.0, 1.0, y_std)

        # s = Xs^T ys  (scaled cross-covariance), feature lanes only
        s = (g_row - nf * y_mean * x_mean) * inv_x_std * featmask / y_std

        # C_s @ v  without materializing C_s:  D (G - n mu mu^T) D v
        def cs_matvec(v):                                       # v: (1, p_aug)
            vd = v * inv_x_std
            u = lax.dot_general(vd, G, (((1,), (0,)), ((), ())),
                                preferred_element_type=jnp.float32)
            u = u - nf * x_mean * jnp.sum(x_mean * vd, keepdims=True)
            return u * inv_x_std * featmask

        # ---- Dayal-MacGregor kernel-PLS recursion (single target y) ---------
        coef = jnp.zeros_like(s)                                # scaled-space coef
        loadings = []                                           # [(p_j, r_j)] rows
        for _ in range(n_components):
            w = s
            w_norm = jnp.sqrt(jnp.sum(w * w, keepdims=True))
            w = w / (w_norm + _EPS)                             # sklearn adds eps here
            # rotation r_k = w_k - sum_{j<k} (p_j . w_k) r_j  == W (P^T W)^-1 e_k
            r = w
            for p_j, r_j in loadings:
                r = r - jnp.sum(p_j * w, keepdims=True) * r_j
            Cr = cs_matvec(r)                                   # (1, p_aug)
            tt = jnp.sum(Cr * r, keepdims=True)                 # t^T t
            p_load = Cr / tt
            q_load = jnp.sum(s * r, keepdims=True) / tt
            s = s - (tt * q_load) * p_load                      # deflate X^T y only
            coef = coef + q_load * r
            loadings.append((p_load, r))

        # ---- predict: standardization folded into the coefficient -----------
        beta = coef * inv_x_std * y_std                         # (1, p_aug)
        b0 = y_mean - jnp.sum(beta * x_mean, keepdims=True)     # (1, 1)
        yhat = lax.dot_general(beta, Xp, (((1,), (1,)), ((), ())),
                               preferred_element_type=jnp.float32) + b0
        o_ref[...] = yhat                                       # (1, m_pad)


# ---------------------------------------------------------------------------
# KryptoPLS forward: fit PLS on windowed train data, predict on windowed X_pred
# ---------------------------------------------------------------------------
def krypto_pls_fit_predict(X_train, y_train, X_pred,
                           lookback: float = 20.0, n_components: int = 3):
    # self.lookback is a learnable scalar Parameter; forward uses max(1, int(.))
    lb = max(1, int(lookback))

    Xw = window_features_jax(X_train, lb)
    yw = jnp.asarray(y_train, jnp.float32)[lb:].reshape(-1)
    Xp = window_features_jax(X_pred, lb)

    n, p = Xw.shape
    m = Xp.shape[0]
    if n < 2:
        raise ValueError("need >= 2 windowed training samples (ddof=1 scaling)")

    # Augmented feature width: [X | y | 1] padded lane-dense to a multiple of 128.
    p_aug = _round_up(p + 2, 128)
    m_pad = _round_up(max(m, 1), 128)

    # n-tiling for the cross-product accumulation grid.
    tile_n = _round_up(n, 8) if n <= 512 else 512
    n_pad = _round_up(n, tile_n)

    Xa = jnp.zeros((n_pad, p_aug), jnp.float32)
    Xa = Xa.at[:n, :p].set(Xw)
    Xa = Xa.at[:n, p].set(yw)           # y column
    Xa = Xa.at[:n, p + 1].set(1.0)      # real-row indicator (column sums / n)

    Xp_p = jnp.zeros((m_pad, p_aug), jnp.float32).at[:m, :p].set(Xp)

    K = n_components
    grid = (n_pad // tile_n,)

    flops = 2 * n_pad * p_aug * p_aug + 2 * m_pad * p_aug + 8 * K * p_aug * p_aug
    bytes_accessed = 4 * (n_pad * p_aug + m_pad * p_aug + m_pad)

    # VMEM budget derived from the real footprint (double-buffered tiles,
    # resident Xp, G scratch + finalize temporaries), capped by physical VMEM.
    vmem_need = 4 * (2 * tile_n * p_aug + 2 * m_pad * p_aug
                     + 9 * p_aug * p_aug + 2 * m_pad)
    vmem_limit = max(32 << 20, vmem_need + (4 << 20))
    try:
        cap = pltpu.get_tpu_info().vmem_capacity_bytes
        vmem_limit = min(vmem_limit, int(cap * 0.85))
    except Exception:
        vmem_limit = min(vmem_limit, 48 << 20)

    # TODO(synk): for very large prediction sets, tile m as a second
    # ("parallel") grid axis instead of keeping Xp fully resident; likewise,
    # batched fits over many series should share one pallas_call with a leading
    # parallel axis to use both v7x TensorCores.
    yhat_row = pl.pallas_call(
        functools.partial(_krypto_pls_kernel, n_real=n, p_real=p,
                          n_components=K),
        out_shape=jax.ShapeDtypeStruct((1, m_pad), jnp.float32),
        grid_spec=pltpu.PrefetchScalarGridSpec(
            num_scalar_prefetch=0,
            grid=grid,
            in_specs=[pl.BlockSpec((tile_n, p_aug), lambda i: (i, 0)),
                      pl.BlockSpec((m_pad, p_aug), lambda i: (0, 0))],
            out_specs=pl.BlockSpec((1, m_pad), lambda i: (0, 0)),
            scratch_shapes=[pltpu.VMEM((p_aug, p_aug), jnp.float32)]),
        compiler_params=pltpu.CompilerParams(
            dimension_semantics=("arbitrary",),
            vmem_limit_bytes=int(vmem_limit)),
        cost_estimate=pl.CostEstimate(flops=int(flops),
                                      transcendentals=int(p_aug + 8),
                                      bytes_accessed=int(bytes_accessed)),
    )(Xa, Xp_p)

    return yhat_row[0, :m]              # 1-d, like sklearn predict on 1-d y


if __name__ == "__main__":
    key = jax.random.PRNGKey(0)
    k1, k2, k3 = jax.random.split(key, 3)

    n_train, n_pred, n_feats = 64, 40, 4
    lookback_init = 20.0                # matches init_lookback=20 in the module
    n_components = 3

    X_train = jax.random.normal(k1, (n_train, n_feats), jnp.float32)
    y_train = jax.random.normal(k2, (n_train,), jnp.float32)
    X_pred = jax.random.normal(k3, (n_pred, n_feats), jnp.float32)

    out = krypto_pls_fit_predict(X_train, y_train, X_pred,
                                 lookback=lookback_init,
                                 n_components=n_components)
    out = jax.block_until_ready(out)

    assert out.shape == (n_pred - int(lookback_init),), out.shape
    assert bool(jnp.all(jnp.isfinite(out)))
    print("KERNEL_OK")
</pallas_src>

<mosaic_0001>
module attributes {stable_mosaic.version = 11 : i64} {
  func.func @_krypto_pls_kernel(%arg0: i32, %arg1: memref<48x128xf32, #tpu.memory_space<vmem>>, %arg2: memref<128x128xf32, #tpu.memory_space<vmem>>, %arg3: memref<1x128xf32, #tpu.memory_space<vmem>>, %arg4: memref<128x128xf32, #tpu.memory_space<vmem>>) attributes {dimension_semantics = [#tpu.dimension_semantics<arbitrary>], iteration_bounds = array<i64: 1>, scalar_prefetch = 0 : i64, scratch_operands = 1 : i64, tpu.core_type = #tpu.core_type<tc>, window_params = [{transform_indices = @transform_0, window_bounds = array<i64: 48, 128>}, {pipeline_mode = #tpu.pipeline_mode<synchronous>, transform_indices = @transform_1, window_bounds = array<i64: 128, 128>}, {pipeline_mode = #tpu.pipeline_mode<synchronous>, transform_indices = @transform_2, window_bounds = array<i64: 1, 128>}]} {
    %c0_i32 = arith.constant 0 : i32
    %0 = arith.cmpi eq, %arg0, %c0_i32 : i32
    %1 = arith.extui %0 : i1 to i32
    %c0_i32_0 = arith.constant 0 : i32
    %2 = arith.cmpi ne, %1, %c0_i32_0 : i32
    scf.if %2 {
      %cst_8 = arith.constant 0.000000e+00 : f32
      %11 = vector.broadcast %cst_8 : f32 to vector<128x128xf32>
      %c0_9 = arith.constant 0 : index
      %c0_10 = arith.constant 0 : index
      %12 = vector.load %arg4[%c0_9, %c0_10] : memref<128x128xf32, #tpu.memory_space<vmem>>, vector<128x128xf32>
      tpu.vector_store %arg4[%c0_9, %c0_10], %11 {strides = array<i32>} : memref<128x128xf32, #tpu.memory_space<vmem>>, vector<128x128xf32>,
    } else {
    }
    %c0 = arith.constant 0 : index
    %c0_1 = arith.constant 0 : index
    %3 = vector.load %arg1[%c0, %c0_1] : memref<48x128xf32, #tpu.memory_space<vmem>>, vector<48x128xf32>
    %c0_2 = arith.constant 0 : index
    %c0_3 = arith.constant 0 : index
    %4 = vector.load %arg4[%c0_2, %c0_3] : memref<128x128xf32, #tpu.memory_space<vmem>>, vector<128x128xf32>
    %cst = arith.constant dense<0.000000e+00> : vector<128x128xf32>
    %5 = tpu.matmul %3, %3, %cst {dimension_numbers = #tpu.dot_dimension_numbers<[0], [0], [1], [1], [0, 1, 1, 1], [], []>} : vector<48x128xf32>, vector<48x128xf32>, vector<128x128xf32> -> vector<128x128xf32>
    %6 = arith.addf %4, %5 : vector<128x128xf32>
    %c0_4 = arith.constant 0 : index
    %c0_5 = arith.constant 0 : index
    %7 = vector.load %arg4[%c0_4, %c0_5] : memref<128x128xf32, #tpu.memory_space<vmem>>, vector<128x128xf32>
    tpu.vector_store %arg4[%c0_4, %c0_5], %6 {strides = array<i32>} : memref<128x128xf32, #tpu.memory_space<vmem>>, vector<128x128xf32>,
    %c0_i32_6 = arith.constant 0 : i32
    %8 = arith.cmpi eq, %arg0, %c0_i32_6 : i32
    %9 = arith.extui %8 : i1 to i32
    %c0_i32_7 = arith.constant 0 : i32
    %10 = arith.cmpi ne, %9, %c0_i32_7 : i32
    scf.if %10 {
      %c0_8 = arith.constant 0 : index
      %c0_9 = arith.constant 0 : index
      %11 = vector.load %arg4[%c0_8, %c0_9] : memref<128x128xf32, #tpu.memory_space<vmem>>, vector<128x128xf32>
      %c0_10 = arith.constant 0 : index
      %c0_11 = arith.constant 0 : index
      %12 = vector.load %arg2[%c0_10, %c0_11] : memref<128x128xf32, #tpu.memory_space<vmem>>, vector<128x128xf32>
      %13 = tpu.iota {dimensions = array<i32: 1>} : vector<1x128xi32>
      %c80_i32 = arith.constant 80 : i32
      %14 = vector.broadcast %c80_i32 : i32 to vector<1x128xi32>
      %15 = arith.cmpi slt, %13, %14 : vector<1x128xi32>
      %16 = arith.extui %15 : vector<1x128xi1> to vector<1x128xi32>
      %17 = arith.sitofp %16 : vector<1x128xi32> to vector<1x128xf32>
      %18 = vector.extract_strided_slice %11 {offsets = [80, 0], sizes = [1, 128], strides = [1, 1]} : vector<128x128xf32> to vector<1x128xf32>
      %19 = vector.extract_strided_slice %11 {offsets = [81, 0], sizes = [1, 128], strides = [1, 1]} : vector<128x128xf32> to vector<1x128xf32>
      %20 = vector.extract_strided_slice %18 {offsets = [0, 80], sizes = [1, 1], strides = [1, 1]} : vector<1x128xf32> to vector<1x1xf32>
      %21 = vector.extract_strided_slice %19 {offsets = [0, 80], sizes = [1, 1], strides = [1, 1]} : vector<1x128xf32> to vector<1x1xf32>
      %cst_12 = arith.constant 0.0227272734 : f32
      %22 = vector.broadcast %cst_12 : f32 to vector<1x128xf32>
      %23 = arith.mulf %19, %22 : vector<1x128xf32>
      %24 = arith.mulf %23, %17 : vector<1x128xf32>
      %cst_13 = arith.constant 0.0227272734 : f32
      %25 = vector.broadcast %cst_13 : f32 to vector<1x1xf32>
      %26 = arith.mulf %21, %25 : vector<1x1xf32>
      %27 = tpu.iota {dimensions = array<i32: 0>} : vector<128x128xi32>
      %28 = tpu.iota {dimensions = array<i32: 1>} : vector<128x128xi32>
      %29 = arith.cmpi eq, %27, %28 : vector<128x128xi32>
      %cst_14 = arith.constant 0.000000e+00 : f32
      %30 = vector.broadcast %cst_14 : f32 to vector<128x128xf32>
      %31 = arith.select %29, %11, %30 : vector<128x128xi1>, vector<128x128xf32>
      %cst_15 = arith.constant dense<0.000000e+00> : vector<128xf32>
      %32 = vector.multi_reduction <add>, %31, %cst_15 [0] : vector<128x128xf32> to vector<128xf32>
      %33 = vector.shape_cast %32 : vector<128xf32> to vector<1x128xf32>
      %34 = arith.mulf %33, %17 : vector<1x128xf32>
      %cst_16 = arith.constant 4.400000e+01 : f32
      %35 = vector.broadcast %cst_16 : f32 to vector<1x128xf32>
      %36 = arith.mulf %35, %24 : vector<1x128xf32>
      %37 = arith.mulf %36, %24 : vector<1x128xf32>
      %38 = arith.subf %34, %37 : vector<1x128xf32>
      %cst_17 = arith.constant 0.0232558139 : f32
      %39 = vector.broadcast %cst_17 : f32 to vector<1x128xf32>
      %40 = arith.mulf %38, %39 : vector<1x128xf32>
      %cst_18 = arith.constant 0.000000e+00 : f32
      %41 = vector.broadcast %cst_18 : f32 to vector<1x128xf32>
      %42 = arith.maximumf %40, %41 : vector<1x128xf32>
      %43 = math.sqrt %42 : vector<1x128xf32>
      %cst_19 = arith.constant 0.000000e+00 : f32
      %44 = vector.broadcast %cst_19 : f32 to vector<1x128xf32>
      %45 = arith.cmpf oeq, %43, %44 : vector<1x128xf32>
      %cst_20 = arith.constant 1.000000e+00 : f32
      %46 = vector.broadcast %cst_20 : f32 to vector<1x128xf32>
      %47 = arith.select %45, %46, %43 : vector<1x128xi1>, vector<1x128xf32>
      %cst_21 = arith.constant 1.000000e+00 : f32
      %48 = vector.broadcast %cst_21 : f32 to vector<1x128xf32>
      %49 = arith.divf %48, %47 : vector<1x128xf32>
      %cst_22 = arith.constant 4.400000e+01 : f32
      %50 = vector.broadcast %cst_22 : f32 to vector<1x1xf32>
      %51 = arith.mulf %50, %26 : vector<1x1xf32>
      %52 = arith.mulf %51, %26 : vector<1x1xf32>
      %53 = arith.subf %20, %52 : vector<1x1xf32>
      %cst_23 = arith.constant 0.0232558139 : f32
      %54 = vector.broadcast %cst_23 : f32 to vector<1x1xf32>
      %55 = arith.mulf %53, %54 : vector<1x1xf32>
      %cst_24 = arith.constant 0.000000e+00 : f32
      %56 = vector.broadcast %cst_24 : f32 to vector<1x1xf32>
      %57 = arith.maximumf %55, %56 : vector<1x1xf32>
      %58 = math.sqrt %57 : vector<1x1xf32>
      %cst_25 = arith.constant 0.000000e+00 : f32
      %59 = vector.broadcast %cst_25 : f32 to vector<1x1xf32>
      %60 = arith.cmpf oeq, %58, %59 : vector<1x1xf32>
      %cst_26 = arith.constant 1.000000e+00 : f32
      %61 = vector.broadcast %cst_26 : f32 to vector<1x1xf32>
      %62 = arith.select %60, %61, %58 : vector<1x1xi1>, vector<1x1xf32>
      %cst_27 = arith.constant 4.400000e+01 : f32
      %63 = vector.broadcast %cst_27 : f32 to vector<1x1xf32>
      %64 = arith.mulf %63, %26 : vector<1x1xf32>
      %65 = vector.broadcast %64 : vector<1x1xf32> to vector<1x128xf32>
      %66 = arith.mulf %65, %24 : vector<1x128xf32>
      %67 = arith.subf %18, %66 : vector<1x128xf32>
      %68 = arith.mulf %67, %49 : vector<1x128xf32>
      %69 = arith.mulf %68, %17 : vector<1x128xf32>
      %70 = vector.broadcast %62 : vector<1x1xf32> to vector<1x128xf32>
      %71 = arith.divf %69, %70 : vector<1x128xf32>
      %cst_28 = arith.constant 0.000000e+00 : f32
      %72 = vector.broadcast %cst_28 : f32 to vector<1x128xf32>
      %73 = arith.mulf %71, %71 : vector<1x128xf32>
      %74 = vector.shape_cast %73 : vector<1x128xf32> to vector<1x1x128xf32>
      %cst_29 = arith.constant dense<0.000000e+00> : vector<1xf32>
      %75 = vector.multi_reduction <add>, %74, %cst_29 [1, 2] : vector<1x1x128xf32> to vector<1xf32>
      %76 = vector.shape_cast %75 : vector<1xf32> to vector<1x1x1xf32>
      %77 = vector.extract %76[0, 0, 0] : f32 from vector<1x1x1xf32>
      %78 = vector.broadcast %77 : f32 to vector<1x1xf32>
      %79 = math.sqrt %78 : vector<1x1xf32>
      %cst_30 = arith.constant 1.1920929E-7 : f32
      %80 = vector.broadcast %cst_30 : f32 to vector<1x1xf32>
      %81 = arith.addf %79, %80 : vector<1x1xf32>
      %82 = vector.broadcast %81 : vector<1x1xf32> to vector<1x128xf32>
      %83 = arith.divf %71, %82 : vector<1x128xf32>
      %84 = arith.mulf %83, %49 : vector<1x128xf32>
      %cst_31 = arith.constant dense<0.000000e+00> : vector<1x128xf32>
      %85 = tpu.matmul %84, %11, %cst_31 {dimension_numbers = #tpu.dot_dimension_numbers<[1], [0], [0], [1], [0, 0, 1, 1], [], []>} : vector<1x128xf32>, vector<128x128xf32>, vector<1x128xf32> -> vector<1x128xf32>
      %cst_32 = arith.constant 4.400000e+01 : f32
      %86 = vector.broadcast %cst_32 : f32 to vector<1x128xf32>
      %87 = arith.mulf %86, %24 : vector<1x128xf32>
      %88 = arith.mulf %24, %84 : vector<1x128xf32>
      %89 = vector.shape_cast %88 : vector<1x128xf32> to vector<1x1x128xf32>
      %cst_33 = arith.constant dense<0.000000e+00> : vector<1xf32>
      %90 = vector.multi_reduction <add>, %89, %cst_33 [1, 2] : vector<1x1x128xf32> to vector<1xf32>
      %91 = vector.shape_cast %90 : vector<1xf32> to vector<1x1x1xf32>
      %92 = vector.extract %91[0, 0, 0] : f32 from vector<1x1x1xf32>
      %93 = vector.broadcast %92 : f32 to vector<1x1xf32>
      %94 = vector.broadcast %93 : vector<1x1xf32> to vector<1x128xf32>
      %95 = arith.mulf %87, %94 : vector<1x128xf32>
      %96 = arith.subf %85, %95 : vector<1x128xf32>
      %97 = arith.mulf %96, %49 : vector<1x128xf32>
      %98 = arith.mulf %97, %17 : vector<1x128xf32>
      %99 = arith.mulf %98, %83 : vector<1x128xf32>
      %100 = vector.shape_cast %99 : vector<1x128xf32> to vector<1x1x128xf32>
      %cst_34 = arith.constant dense<0.000000e+00> : vector<1xf32>
      %101 = vector.multi_reduction <add>, %100, %cst_34 [1, 2] : vector<1x1x128xf32> to vector<1xf32>
      %102 = vector.shape_cast %101 : vector<1xf32> to vector<1x1x1xf32>
      %103 = vector.extract %102[0, 0, 0] : f32 from vector<1x1x1xf32>
      %104 = vector.broadcast %103 : f32 to vector<1x1xf32>
      %105 = vector.broadcast %104 : vector<1x1xf32> to vector<1x128xf32>
      %106 = arith.divf %98, %105 : vector<1x128xf32>
      %107 = arith.mulf %71, %83 : vector<1x128xf32>
      %108 = vector.shape_cast %107 : vector<1x128xf32> to vector<1x1x128xf32>
      %cst_35 = arith.constant dense<0.000000e+00> : vector<1xf32>
      %109 = vector.multi_reduction <add>, %108, %cst_35 [1, 2] : vector<1x1x128xf32> to vector<1xf32>
      %110 = vector.shape_cast %109 : vector<1xf32> to vector<1x1x1xf32>
      %111 = vector.extract %110[0, 0, 0] : f32 from vector<1x1x1xf32>
      %112 = vector.broadcast %111 : f32 to vector<1x1xf32>
      %113 = arith.divf %112, %104 : vector<1x1xf32>
      %114 = arith.mulf %104, %113 : vector<1x1xf32>
      %115 = vector.broadcast %114 : vector<1x1xf32> to vector<1x128xf32>
      %116 = arith.mulf %115, %106 : vector<1x128xf32>
      %117 = arith.subf %71, %116 : vector<1x128xf32>
      %118 = vector.broadcast %113 : vector<1x1xf32> to vector<1x128xf32>
      %119 = arith.mulf %118, %83 : vector<1x128xf32>
      %120 = arith.addf %72, %119 : vector<1x128xf32>
      %121 = arith.mulf %117, %117 : vector<1x128xf32>
      %122 = vector.shape_cast %121 : vector<1x128xf32> to vector<1x1x128xf32>
      %cst_36 = arith.constant dense<0.000000e+00> : vector<1xf32>
      %123 = vector.multi_reduction <add>, %122, %cst_36 [1, 2] : vector<1x1x128xf32> to vector<1xf32>
      %124 = vector.shape_cast %123 : vector<1xf32> to vector<1x1x1xf32>
      %125 = vector.extract %124[0, 0, 0] : f32 from vector<1x1x1xf32>
      %126 = vector.broadcast %125 : f32 to vector<1x1xf32>
      %127 = math.sqrt %126 : vector<1x1xf32>
      %cst_37 = arith.constant 1.1920929E-7 : f32
      %128 = vector.broadcast %cst_37 : f32 to vector<1x1xf32>
      %129 = arith.addf %127, %128 : vector<1x1xf32>
      %130 = vector.broadcast %129 : vector<1x1xf32> to vector<1x128xf32>
      %131 = arith.divf %117, %130 : vector<1x128xf32>
      %132 = arith.mulf %106, %131 : vector<1x128xf32>
      %133 = vector.shape_cast %132 : vector<1x128xf32> to vector<1x1x128xf32>
      %cst_38 = arith.constant dense<0.000000e+00> : vector<1xf32>
      %134 = vector.multi_reduction <add>, %133, %cst_38 [1, 2] : vector<1x1x128xf32> to vector<1xf32>
      %135 = vector.shape_cast %134 : vector<1xf32> to vector<1x1x1xf32>
      %136 = vector.extract %135[0, 0, 0] : f32 from vector<1x1x1xf32>
      %137 = vector.broadcast %136 : f32 to vector<1x1xf32>
      %138 = vector.broadcast %137 : vector<1x1xf32> to vector<1x128xf32>
      %139 = arith.mulf %138, %83 : vector<1x128xf32>
      %140 = arith.subf %131, %139 : vector<1x128xf32>
      %141 = arith.mulf %140, %49 : vector<1x128xf32>
      %cst_39 = arith.constant dense<0.000000e+00> : vector<1x128xf32>
      %142 = tpu.matmul %141, %11, %cst_39 {dimension_numbers = #tpu.dot_dimension_numbers<[1], [0], [0], [1], [0, 0, 1, 1], [], []>} : vector<1x128xf32>, vector<128x128xf32>, vector<1x128xf32> -> vector<1x128xf32>
      %cst_40 = arith.constant 4.400000e+01 : f32
      %143 = vector.broadcast %cst_40 : f32 to vector<1x128xf32>
      %144 = arith.mulf %143, %24 : vector<1x128xf32>
      %145 = arith.mulf %24, %141 : vector<1x128xf32>
      %146 = vector.shape_cast %145 : vector<1x128xf32> to vector<1x1x128xf32>
      %cst_41 = arith.constant dense<0.000000e+00> : vector<1xf32>
      %147 = vector.multi_reduction <add>, %146, %cst_41 [1, 2] : vector<1x1x128xf32> to vector<1xf32>
      %148 = vector.shape_cast %147 : vector<1xf32> to vector<1x1x1xf32>
      %149 = vector.extract %148[0, 0, 0] : f32 from vector<1x1x1xf32>
      %150 = vector.broadcast %149 : f32 to vector<1x1xf32>
      %151 = vector.broadcast %150 : vector<1x1xf32> to vector<1x128xf32>
      %152 = arith.mulf %144, %151 : vector<1x128xf32>
      %153 = arith.subf %142, %152 : vector<1x128xf32>
      %154 = arith.mulf %153, %49 : vector<1x128xf32>
      %155 = arith.mulf %154, %17 : vector<1x128xf32>
      %156 = arith.mulf %155, %140 : vector<1x128xf32>
      %157 = vector.shape_cast %156 : vector<1x128xf32> to vector<1x1x128xf32>
      %cst_42 = arith.constant dense<0.000000e+00> : vector<1xf32>
      %158 = vector.multi_reduction <add>, %157, %cst_42 [1, 2] : vector<1x1x128xf32> to vector<1xf32>
      %159 = vector.shape_cast %158 : vector<1xf32> to vector<1x1x1xf32>
      %160 = vector.extract %159[0, 0, 0] : f32 from vector<1x1x1xf32>
      %161 = vector.broadcast %160 : f32 to vector<1x1xf32>
      %162 = vector.broadcast %161 : vector<1x1xf32> to vector<1x128xf32>
      %163 = arith.divf %155, %162 : vector<1x128xf32>
      %164 = arith.mulf %117, %140 : vector<1x128xf32>
      %165 = vector.shape_cast %164 : vector<1x128xf32> to vector<1x1x128xf32>
      %cst_43 = arith.constant dense<0.000000e+00> : vector<1xf32>
      %166 = vector.multi_reduction <add>, %165, %cst_43 [1, 2] : vector<1x1x128xf32> to vector<1xf32>
      %167 = vector.shape_cast %166 : vector<1xf32> to vector<1x1x1xf32>
      %168 = vector.extract %167[0, 0, 0] : f32 from vector<1x1x1xf32>
      %169 = vector.broadcast %168 : f32 to vector<1x1xf32>
      %170 = arith.divf %169, %161 : vector<1x1xf32>
      %171 = arith.mulf %161, %170 : vector<1x1xf32>
      %172 = vector.broadcast %171 : vector<1x1xf32> to vector<1x128xf32>
      %173 = arith.mulf %172, %163 : vector<1x128xf32>
      %174 = arith.subf %117, %173 : vector<1x128xf32>
      %175 = vector.broadcast %170 : vector<1x1xf32> to vector<1x128xf32>
      %176 = arith.mulf %175, %140 : vector<1x128xf32>
      %177 = arith.addf %120, %176 : vector<1x128xf32>
      %178 = arith.mulf %174, %174 : vector<1x128xf32>
      %179 = vector.shape_cast %178 : vector<1x128xf32> to vector<1x1x128xf32>
      %cst_44 = arith.constant dense<0.000000e+00> : vector<1xf32>
      %180 = vector.multi_reduction <add>, %179, %cst_44 [1, 2] : vector<1x1x128xf32> to vector<1xf32>
      %181 = vector.shape_cast %180 : vector<1xf32> to vector<1x1x1xf32>
      %182 = vector.extract %181[0, 0, 0] : f32 from vector<1x1x1xf32>
      %183 = vector.broadcast %182 : f32 to vector<1x1xf32>
      %184 = math.sqrt %183 : vector<1x1xf32>
      %cst_45 = arith.constant 1.1920929E-7 : f32
      %185 = vector.broadcast %cst_45 : f32 to vector<1x1xf32>
      %186 = arith.addf %184, %185 : vector<1x1xf32>
      %187 = vector.broadcast %186 : vector<1x1xf32> to vector<1x128xf32>
      %188 = arith.divf %174, %187 : vector<1x128xf32>
      %189 = arith.mulf %106, %188 : vector<1x128xf32>
      %190 = vector.shape_cast %189 : vector<1x128xf32> to vector<1x1x128xf32>
      %cst_46 = arith.constant dense<0.000000e+00> : vector<1xf32>
      %191 = vector.multi_reduction <add>, %190, %cst_46 [1, 2] : vector<1x1x128xf32> to vector<1xf32>
      %192 = vector.shape_cast %191 : vector<1xf32> to vector<1x1x1xf32>
      %193 = vector.extract %192[0, 0, 0] : f32 from vector<1x1x1xf32>
      %194 = vector.broadcast %193 : f32 to vector<1x1xf32>
      %195 = vector.broadcast %194 : vector<1x1xf32> to vector<1x128xf32>
      %196 = arith.mulf %195, %83 : vector<1x128xf32>
      %197 = arith.subf %188, %196 : vector<1x128xf32>
      %198 = arith.mulf %163, %188 : vector<1x128xf32>
      %199 = vector.shape_cast %198 : vector<1x128xf32> to vector<1x1x128xf32>
      %cst_47 = arith.constant dense<0.000000e+00> : vector<1xf32>
      %200 = vector.multi_reduction <add>, %199, %cst_47 [1, 2] : vector<1x1x128xf32> to vector<1xf32>
      %201 = vector.shape_cast %200 : vector<1xf32> to vector<1x1x1xf32>
      %202 = vector.extract %201[0, 0, 0] : f32 from vector<1x1x1xf32>
      %203 = vector.broadcast %202 : f32 to vector<1x1xf32>
      %204 = vector.broadcast %203 : vector<1x1xf32> to vector<1x128xf32>
      %205 = arith.mulf %204, %140 : vector<1x128xf32>
      %206 = arith.subf %197, %205 : vector<1x128xf32>
      %207 = arith.mulf %206, %49 : vector<1x128xf32>
      %cst_48 = arith.constant dense<0.000000e+00> : vector<1x128xf32>
      %208 = tpu.matmul %207, %11, %cst_48 {dimension_numbers = #tpu.dot_dimension_numbers<[1], [0], [0], [1], [0, 0, 1, 1], [], []>} : vector<1x128xf32>, vector<128x128xf32>, vector<1x128xf32> -> vector<1x128xf32>
      %cst_49 = arith.constant 4.400000e+01 : f32
      %209 = vector.broadcast %cst_49 : f32 to vector<1x128xf32>
      %210 = arith.mulf %209, %24 : vector<1x128xf32>
      %211 = arith.mulf %24, %207 : vector<1x128xf32>
      %212 = vector.shape_cast %211 : vector<1x128xf32> to vector<1x1x128xf32>
      %cst_50 = arith.constant dense<0.000000e+00> : vector<1xf32>
      %213 = vector.multi_reduction <add>, %212, %cst_50 [1, 2] : vector<1x1x128xf32> to vector<1xf32>
      %214 = vector.shape_cast %213 : vector<1xf32> to vector<1x1x1xf32>
      %215 = vector.extract %214[0, 0, 0] : f32 from vector<1x1x1xf32>
      %216 = vector.broadcast %215 : f32 to vector<1x1xf32>
      %217 = vector.broadcast %216 : vector<1x1xf32> to vector<1x128xf32>
      %218 = arith.mulf %210, %217 : vector<1x128xf32>
      %219 = arith.subf %208, %218 : vector<1x128xf32>
      %220 = arith.mulf %219, %49 : vector<1x128xf32>
      %221 = arith.mulf %220, %17 : vector<1x128xf32>
      %222 = arith.mulf %221, %206 : vector<1x128xf32>
      %223 = vector.shape_cast %222 : vector<1x128xf32> to vector<1x1x128xf32>
      %cst_51 = arith.constant dense<0.000000e+00> : vector<1xf32>
      %224 = vector.multi_reduction <add>, %223, %cst_51 [1, 2] : vector<1x1x128xf32> to vector<1xf32>
      %225 = vector.shape_cast %224 : vector<1xf32> to vector<1x1x1xf32>
      %226 = vector.extract %225[0, 0, 0] : f32 from vector<1x1x1xf32>
      %227 = vector.broadcast %226 : f32 to vector<1x1xf32>
      %228 = arith.mulf %174, %206 : vector<1x128xf32>
      %229 = vector.shape_cast %228 : vector<1x128xf32> to vector<1x1x128xf32>
      %cst_52 = arith.constant dense<0.000000e+00> : vector<1xf32>
      %230 = vector.multi_reduction <add>, %229, %cst_52 [1, 2] : vector<1x1x128xf32> to vector<1xf32>
      %231 = vector.shape_cast %230 : vector<1xf32> to vector<1x1x1xf32>
      %232 = vector.extract %231[0, 0, 0] : f32 from vector<1x1x1xf32>
      %233 = vector.broadcast %232 : f32 to vector<1x1xf32>
      %234 = arith.divf %233, %227 : vector<1x1xf32>
      %235 = vector.broadcast %234 : vector<1x1xf32> to vector<1x128xf32>
      %236 = arith.mulf %235, %206 : vector<1x128xf32>
      %237 = arith.addf %177, %236 : vector<1x128xf32>
      %238 = arith.mulf %237, %49 : vector<1x128xf32>
      %239 = vector.broadcast %62 : vector<1x1xf32> to vector<1x128xf32>
      %240 = arith.mulf %238, %239 : vector<1x128xf32>
      %241 = arith.mulf %240, %24 : vector<1x128xf32>
      %242 = vector.shape_cast %241 : vector<1x128xf32> to vector<1x1x128xf32>
      %cst_53 = arith.constant dense<0.000000e+00> : vector<1xf32>
      %243 = vector.multi_reduction <add>, %242, %cst_53 [1, 2] : vector<1x1x128xf32> to vector<1xf32>
      %244 = vector.shape_cast %243 : vector<1xf32> to vector<1x1x1xf32>
      %245 = vector.extract %244[0, 0, 0] : f32 from vector<1x1x1xf32>
      %246 = vector.broadcast %245 : f32 to vector<1x1xf32>
      %247 = arith.subf %26, %246 : vector<1x1xf32>
      %cst_54 = arith.constant dense<0.000000e+00> : vector<1x128xf32>
      %248 = tpu.matmul %240, %12, %cst_54 {dimension_numbers = #tpu.dot_dimension_numbers<[1], [1], [0], [0], [0, 0, 1, 0], [], []>} : vector<1x128xf32>, vector<128x128xf32>, vector<1x128xf32> -> vector<1x128xf32>
      %249 = vector.broadcast %247 : vector<1x1xf32> to vector<1x128xf32>
      %250 = arith.addf %248, %249 : vector<1x128xf32>
      %c0_55 = arith.constant 0 : index
      %c0_56 = arith.constant 0 : index
      %251 = vector.load %arg3[%c0_55, %c0_56] : memref<1x128xf32, #tpu.memory_space<vmem>>, vector<1x128xf32>
      tpu.vector_store %arg3[%c0_55, %c0_56], %250 {strides = array<i32>} : memref<1x128xf32, #tpu.memory_space<vmem>>, vector<1x128xf32>,
    } else {
    }
    return
  }
  func.func @transform_0(%arg0: i32) -> (i32, i32) {
    %c0_i32 = arith.constant 0 : i32
    %c0_i32_0 = arith.constant 0 : i32
    return %arg0, %c0_i32 : i32, i32
  }
  func.func @transform_1(%arg0: i32) -> (i32, i32) {
    %c0_i32 = arith.constant 0 : i32
    %c0_i32_0 = arith.constant 0 : i32
    %c0_i32_1 = arith.constant 0 : i32
    return %c0_i32, %c0_i32_0 : i32, i32
  }
  func.func @transform_2(%arg0: i32) -> (i32, i32) {
    %c0_i32 = arith.constant 0 : i32
    %c0_i32_0 = arith.constant 0 : i32
    %c0_i32_1 = arith.constant 0 : i32
    return %c0_i32, %c0_i32_0 : i32, i32
  }
}

</mosaic_0001>

<bundles_post_ra>
// kernel: tpu_custom_call.1
= control target key start
LH: loop header
LB: loop body
LE: loop exit
PB: predicated region body
PF: predicated region fallthrough
CT: control target
= control target key end

     0   :  { %7 = vsyncpa [#allocation4], 0  ;;  %s1953_s0 = inlined_call_operand.hbm [shape: f32[48,128], index: 0, kind: input, shape index: {}]   ;;  %s1954_s1 = inlined_call_operand.hbm [shape: f32[128,128], index: 1, kind: input, shape index: {}]   ;;  %s1955_s2 = inlined_call_operand.hbm [shape: f32[1,128], index: 2, kind: output, shape index: {}]  }
   0x1   :  { %8 = vsyncpa [#allocation7], 0 }
   0x2   :  { %9 = vsyncpa [#allocation5], 0  ;;  %s1640_s9 = smov [#allocation3]   ;;  %s1568_s13 = scalar_lea.hbm %s1953_s0, 768 }
   0x3   :  { %s15_s10 = sshll.u32 %s1640_s9, 4  ;;  %p1569_p0 = scmp.ne.s32.totalorder %s1953_s0, %s1568_s13  ;;  %s16_s10 = int_to_ptr.vmem [resolvable:$true] %s15_s10 }
   0x4   :  { %p1572_p1 = scmp.lt.u32.totalorder %s1568_s13, %s1953_s0 }
   0x6   :  { %p1574_p2 = pnand %p1572_p1, %p1569_p0 }
   0x8   :  { %1577 = shalt.err (!%p1574_p2)
}
   0x9   :  { %s1578_s18 = scalar_lea.vmem %s16_s10, 768  ;;  %p1583_p4 = scmp.lt.s32.totalorder %s16_s10, %s16_s10 }
   0xa   :  { %p1579_p3 = scmp.ne.s32.totalorder %s16_s10, %s1578_s18  ;;  %p1584_p5 = scmp.lt.s32.totalorder %s1578_s18, %s1578_s18 }
   0xc   :  { %p1585_p6 = por %p1584_p5, %p1583_p4 }
   0xe   :  { %p1586_p7 = pnand %p1585_p6, %p1579_p3 }
  0x10   :  { %1589 = shalt.err (!%p1586_p7)
}
  0x11   :  { %s1641_s19 = smov 128   ;;  %s1642_s20 = smov 8  }
  0x12   :  { %21 = dma.hbm_to_vmem [thread:$0]  %s1953_s0, 768, %s16_s10, [#allocation4], %s1641_s19, %s1641_s19, %s1642_s20  }
  0x13   :  { %s1643_s23 = smov [#allocation6]   ;;  %s1590_s27 = scalar_lea.hbm %s1954_s1, 2048 }
  0x14   :  { %s27_s24 = sshll.u32 %s1643_s23, 4  ;;  %p1591_p8 = scmp.ne.s32.totalorder %s1954_s1, %s1590_s27  ;;  %s28_s24 = int_to_ptr.vmem [resolvable:$true] %s27_s24 }
  0x15   :  { %p1594_p9 = scmp.lt.u32.totalorder %s1590_s27, %s1954_s1 }
  0x17   :  { %p1596_p10 = pnand %p1594_p9, %p1591_p8 }
  0x19   :  { %1599 = shalt.err (!%p1596_p10)
}
  0x1a   :  { %s1600_s4 = scalar_lea.vmem %s28_s24, 2048  ;;  %p1605_p12 = scmp.lt.s32.totalorder %s28_s24, %s28_s24 }
  0x1b   :  { %p1601_p11 = scmp.ne.s32.totalorder %s28_s24, %s1600_s4  ;;  %p1606_p13 = scmp.lt.s32.totalorder %s1600_s4, %s1600_s4 }
  0x1d   :  { %p1607_p0 = por %p1606_p13, %p1605_p12 }
  0x1f   :  { %p1608_p1 = pnand %p1607_p0, %p1601_p11 }
  0x21   :  { %1611 = shalt.err (!%p1608_p1)
}
  0x22   :  { %33 = dma.hbm_to_vmem [thread:$0]  %s1954_s1, 2048, %s28_s24, [#allocation7], %s1641_s19, %s1641_s19, %s1642_s20  }
  0x23   :  { %1634 = dma.done.wait [#allocation4], 768  }
  0x24   :  { %1635 = vsyncadd [#allocation4], 4294966528 }
  0x25   :  { %1636 = dma.done.wait [#allocation7], 2048  }
  0x26   :  { %1637 = vsyncadd [#allocation7], 4294965248  ;;  %v60_v0 = vld [vmem:[#allocation3] sm:$0xff]  ;;  %v61_v1 = vld [vmem:[#allocation3 + $0x8] sm:$0xff]  ;;  %vm114_vm0 = vcmask 392192   ;;  %v1644_v25 = vmov 0.0|0.0   ;;  %v375_v27 = vlaneseq }
  0x27   :  { %82 = vxpose.xlu0.b32.start [1/6] (short) %v60_v0, 128  ;;  %v62_v2 = vld [vmem:[#allocation3 + $0x10] sm:$0xff]  ;;  %v63_v3 = vld [vmem:[#allocation3 + $0x18] sm:$0xff]  ;;  %v1391_v4 = vpack.c.bf16 %v61_v1, %v60_v0  ;;  %v64_v6 = vld [vmem:[#allocation3 + $0x20] sm:$0xff]  ;;  %1427 = vmatprep.subr.bf16.mxu0 %v1644_v25  ;;  %v1645_v26 = vmov 80   ;;  %s1648_s21 = smov [#allocation8]  }
  0x28   :  { %v1395_v5 = vpack.c.bf16 %v63_v3, %v62_v2  ;;  %v65_v7 = vld [vmem:[#allocation3 + $0x28] sm:$0xff]  ;;  %1540 = vset.pattern.permute.xlu1 %v1645_v26  ;;  %v1706_v28 = vshrl.u32 %v375_v27, 7  ;;  %v1708_v29 = vand.u32 127, %v375_v27  ;;  %s1098_s22 = sshll.u32 %s1648_s21, 4  ;;  %s1099_s22 = int_to_ptr.vmem [resolvable:$true] %s1098_s22 }
  0x29   :  { %1392 = vmatprep.subr.bf16.mxu1 %v1391_v4  ;;  %v1399_v8 = vpack.c.bf16 %v65_v7, %v64_v6  ;;  %s1612_s23 = scalar_lea.vmem %s1099_s22, 16  ;;  %s1616_s24 = scalar_lea.vmem %s1099_s22, 32 }
  0x2a   :  { %1394 = vmatpush3.bf16.msra.mxu1 %v1391_v4  ;;  %v384_v30 = vadd.s32 8, %v1706_v28  ;;  %vm399_vm2 = vcmp.eq.s32.totalorder %v1706_v28, %v1708_v29  ;;  %v385_v37 = vadd.s32 16, %v1706_v28  ;;  %v386_v38 = vadd.s32 24, %v1706_v28  ;;  %p1613_p2 = scmp.ne.s32.totalorder %s1099_s22, %s1612_s23  ;;  %p1617_p3 = scmp.lt.s32.totalorder %s1099_s22, %s1099_s22 }
  0x2b   :  { %83 = vxpose.xlu0.b32.cont [2/6] (short) %v61_v1, 128  ;;  %1396 = vmatprep.subr.bf16.mxu1 %v1395_v5  ;;  %v387_v44 = vadd.s32 32, %v1706_v28  ;;  %v388_v46 = vadd.s32 40, %v1706_v28  ;;  %v389_v53 = vadd.s32 48, %v1706_v28  ;;  %v390_v55 = vadd.s32 56, %v1706_v28  ;;  %p1618_p4 = scmp.lt.s32.totalorder %s1616_s24, %s1612_s23 }
  0x2c   :  { %vm400_vm1 = vcmp.eq.s32.totalorder %v384_v30, %v1708_v29  ;;  %vm401_vm3 = vcmp.eq.s32.totalorder %v385_v37, %v1708_v29  ;;  %vm402_vm4 = vcmp.eq.s32.totalorder %v386_v38, %v1708_v29  ;;  %v391_v62 = vadd.s32 64, %v1706_v28 }
  0x2d   :  { %vm403_vm5 = vcmp.eq.s32.totalorder %v387_v44, %v1708_v29  ;;  %vm404_vm6 = vcmp.eq.s32.totalorder %v388_v46, %v1708_v29  ;;  %vm405_vm7 = vcmp.eq.s32.totalorder %v389_v53, %v1708_v29  ;;  %vm406_vm8 = vcmp.eq.s32.totalorder %v390_v55, %v1708_v29  ;;  %p1619_p5 = por %p1618_p4, %p1617_p3 }
  0x2e   :  { %1398 = vmatpush3.bf16.msra.mxu1 %v1395_v5  ;;  %v392_v0 = vadd.s32 72, %v1706_v28  ;;  %vm407_vm9 = vcmp.eq.s32.totalorder %v391_v62, %v1708_v29 }
  0x2f   :  { %84 = vxpose.xlu0.b32.cont [3/6] (short) %v62_v2, 128  ;;  %1400 = vmatprep.subr.bf16.mxu1 %v1399_v8  ;;  %p1620_p6 = pnand %p1619_p5, %p1613_p2 }
  0x30   :  { %vm408_vm10 = vcmp.eq.s32.totalorder %v392_v0, %v1708_v29 }
  0x32   :  { %1402 = vmatpush3.bf16.msra.mxu1 %v1399_v8 }
  0x33   :  { %85 = vxpose.xlu0.b32.cont [4/6] (short) %v63_v3, 128  ;;  %1403 = vmatprep.subr.bf16.mxu1 %v1644_v25 }
  0x37   :  { %86 = vxpose.xlu0.b32.cont [5/6] (short) %v64_v6, 128 }
  0x3b   :  { %87 = vxpose.xlu0.b32.end [6/6] (short) %v65_v7, 128  ;;  %v393_v7 = vadd.s32 80, %v1706_v28 }
  0x3d   :  { %vm409_vm11 = vcmp.eq.s32.totalorder %v393_v7, %v1708_v29 }
  0x64   :  { %1541 = vset.pattern.permute.xlu0 %v1645_v26 }
  0xa7   :  { %v98_v9 = vpop.trf.xlu0 }
  0xa8   :  { %1227 = vmatprep.mubr.msk.f32.mxu1 %vm114_vm0, %v98_v9 }
  0xab   :  { %v99_v10 = vpop.trf.xlu0 }
  0xac   :  { %1228 = vmatmul.mubr.msk.f32.vlgmr.msra.gmra.mrb[0].mxu1 %vm114_vm0, %v99_v10  ;;  %v394_v10 = vadd.s32 88, %v1706_v28 }
  0xae   :  { %vm410_vm12 = vcmp.eq.s32.totalorder %v394_v10, %v1708_v29 }
  0xaf   :  { %v100_v11 = vpop.trf.xlu0 }
  0xb0   :  { %1230 = vmatprep.mubr.msk.f32.mxu1 %vm114_vm0, %v100_v11 }
  0xb3   :  { %v101_v12 = vpop.trf.xlu0 }
  0xb4   :  { %1231 = vmatmul.mubr.msk.f32.gmra.mrb[2].mxu1 %vm114_vm0, %v101_v12 }
  0xb7   :  { %v102_v13 = vpop.trf.xlu0 }
  0xb8   :  { %1233 = vmatprep.mubr.msk.f32.mxu1 %vm114_vm0, %v102_v13 }
  0xbb   :  { %v103_v14 = vpop.trf.xlu0 }
  0xbc   :  { %1234 = vmatmul.mubr.msk.f32.gmra.mrb[4].mxu1 %vm114_vm0, %v103_v14 }
  0xbf   :  { %v104_v15 = vpop.trf.xlu0 }
  0xc0   :  { %1236 = vmatprep.mubr.msk.f32.mxu1 %vm114_vm0, %v104_v15 }
  0xc3   :  { %v105_v16 = vpop.trf.xlu0 }
  0xc4   :  { %1237 = vmatmul.mubr.msk.f32.gmra.mrb[6].mxu1 %vm114_vm0, %v105_v16  ;;  %v396_v16 = vadd.s32 104, %v1706_v28 }
  0xc6   :  { %vm412_vm13 = vcmp.eq.s32.totalorder %v396_v16, %v1708_v29 }
  0xc7   :  { %v106_v17 = vpop.trf.xlu0 }
  0xc8   :  { %1239 = vmatprep.mubr.msk.f32.mxu1 %vm114_vm0, %v106_v17  ;;  %v395_v17 = vadd.s32 96, %v1706_v28 }
  0xca   :  { %vm411_vm14 = vcmp.eq.s32.totalorder %v395_v17, %v1708_v29 }
  0xcb   :  { %v107_v18 = vpop.trf.xlu0 }
  0xcc   :  { %1240 = vmatmul.mubr.msk.f32.gmra.mrb[8].mxu1 %vm114_vm0, %v107_v18 }
  0xcf   :  { %v108_v19 = vpop.trf.xlu0 }
  0xd0   :  { %1242 = vmatprep.mubr.msk.f32.mxu1 %vm114_vm0, %v108_v19 }
  0xd3   :  { %v109_v20 = vpop.trf.xlu0 }
  0xd4   :  { %1243 = vmatmul.mubr.msk.f32.gmra.mrb[10].mxu1 %vm114_vm0, %v109_v20 }
  0xd7   :  { %v110_v21 = vpop.trf.xlu0 }
  0xd8   :  { %1245 = vmatprep.mubr.msk.f32.mxu1 %vm114_vm0, %v110_v21 }
  0xdb   :  { %v111_v22 = vpop.trf.xlu0 }
  0xdc   :  { %1246 = vmatmul.mubr.msk.f32.gmra.mrb[12].mxu1 %vm114_vm0, %v111_v22 }
  0xdf   :  { %v112_v23 = vpop.trf.xlu0 }
  0xe0   :  { %1248 = vmatprep.mubr.msk.f32.mxu1 %vm114_vm0, %v112_v23 }
  0xe3   :  { %v113_v24 = vpop.trf.xlu0 }
  0xe4   :  { %1249 = vmatmul.mubr.msk.f32.gmra.mrb[14].mxu1 %vm114_vm0, %v113_v24 }
 0x17f   :  { %v1229_v31 = vpop.f32.mrb[0].mxu1 }
 0x180   :  { %v416_v32 = vsel %vm400_vm1, %v1229_v31, 0.0  ;;  %v229_v33 = vpop.f32.mrb[1].mxu1 }
 0x181   :  { %v415_v34 = vsel %vm399_vm2, %v229_v33, 0.0  ;;  %v1714_v35 = vpack.c.bf16 %v1229_v31, %v229_v33 }
 0x182   :  { %v431_v36 = vadd.f32 %v416_v32, %v415_v34  ;;  %v398_v34 = vadd.s32 120, %v1706_v28 }
 0x183   :  { %1405 = vmatpush3.bf16.msra.mxu1 %v1714_v35  ;;  %1429 = vmatpush3.bf16.msra.mxu0 %v1714_v35 }
 0x184   :  { %1406 = vmatprep.subr.bf16.mxu1 %v1644_v25  ;;  %1430 = vmatprep.subr.bf16.mxu0 %v1644_v25  ;;  %vm414_vm15 = vcmp.eq.s32.totalorder %v398_v34, %v1708_v29 }
 0x187   :  { %v1232_v39 = vpop.f32.mrb[2].mxu1 }
 0x188   :  { %v239_v40 = vpop.f32.mrb[3].mxu1  ;;  %v418_v45 = vsel %vm402_vm4, %v1232_v39, 0.0  ;;  %vm377_vm4 = vcmp.lt.s32.totalorder %v1708_v29, 80 }
 0x189   :  { %v417_v41 = vsel %vm401_vm3, %v239_v40, 0.0  ;;  %v1724_v42 = vpack.c.bf16 %v1232_v39, %v239_v40 }
 0x18a   :  { %v432_v43 = vadd.f32 %v431_v36, %v417_v41  ;;  %v397_v36 = vadd.s32 112, %v1706_v28 }
 0x18b   :  { %1408 = vmatpush3.bf16.msra.mxu1 %v1724_v42  ;;  %1432 = vmatpush3.bf16.msra.mxu0 %v1724_v42 }
 0x18c   :  { %v433_v47 = vadd.f32 %v432_v43, %v418_v45  ;;  %1409 = vmatprep.subr.bf16.mxu1 %v1644_v25  ;;  %1433 = vmatprep.subr.bf16.mxu0 %v1644_v25  ;;  %vm413_vm0 = vcmp.eq.s32.totalorder %v397_v36, %v1708_v29 }
 0x18f   :  { %v1235_v48 = vpop.f32.mrb[4].mxu1 }
 0x190   :  { %v249_v49 = vpop.f32.mrb[5].mxu1  ;;  %v420_v54 = vsel %vm404_vm6, %v1235_v48, 0.0 }
 0x191   :  { %v419_v50 = vsel %vm403_vm5, %v249_v49, 0.0  ;;  %v1734_v51 = vpack.c.bf16 %v1235_v48, %v249_v49 }
 0x192   :  { %v434_v52 = vadd.f32 %v433_v47, %v419_v50 }
 0x193   :  { %1411 = vmatpush3.bf16.msra.mxu1 %v1734_v51  ;;  %1435 = vmatpush3.bf16.msra.mxu0 %v1734_v51 }
 0x194   :  { %v435_v56 = vadd.f32 %v434_v52, %v420_v54  ;;  %1412 = vmatprep.subr.bf16.mxu1 %v1644_v25  ;;  %1436 = vmatprep.subr.bf16.mxu0 %v1644_v25 }
 0x197   :  { %v1238_v57 = vpop.f32.mrb[6].mxu1 }
 0x198   :  { %v259_v58 = vpop.f32.mrb[7].mxu1  ;;  %v422_v63 = vsel %vm406_vm8, %v1238_v57, 0.0  ;;  %vm509_vm8 = vcmask 1040384  }
 0x199   :  { %v421_v59 = vsel %vm405_vm7, %v259_v58, 0.0  ;;  %v1744_v60 = vpack.c.bf16 %v1238_v57, %v259_v58  ;;  %v1646_v58 = vmov 0.0  }
 0x19a   :  { %v436_v61 = vadd.f32 %v435_v56, %v421_v59  ;;  %v1802_v59 = vsel %vm377_vm4, 1.0, %v1646_v58 }
 0x19b   :  { %1414 = vmatpush3.bf16.msra.mxu1 %v1744_v60  ;;  %1438 = vmatpush3.bf16.msra.mxu0 %v1744_v60 }
 0x19c   :  { %v437_v1 = vadd.f32 %v436_v61, %v422_v63  ;;  %1415 = vmatprep.subr.bf16.mxu1 %v1644_v25  ;;  %1439 = vmatprep.subr.bf16.mxu0 %v1644_v25 }
 0x19f   :  { %v1241_v2 = vpop.f32.mrb[8].mxu1 }
 0x1a0   :  { %v269_v3 = vpop.f32.mrb[9].mxu1  ;;  %v424_v8 = vsel %vm408_vm10, %v1241_v2, 0.0 }
 0x1a1   :  { %v423_v4 = vsel %vm407_vm9, %v269_v3, 0.0  ;;  %v1754_v5 = vpack.c.bf16 %v1241_v2, %v269_v3  ;;  %vm1647_vm9 = vmmov 0  }
 0x1a2   :  { %v438_v6 = vadd.f32 %v437_v1, %v423_v4  ;;  %1283 = vmatprep.mubr.msk.f32.mxu1 %vm1647_vm9, %v1646_v58  ;;  %1318 = vmatprep.mubr.msk.f32.mxu0 %vm1647_vm9, %v1646_v58 }
 0x1a3   :  { %1417 = vmatpush3.bf16.msra.mxu1 %v1754_v5  ;;  %1441 = vmatpush3.bf16.msra.mxu0 %v1754_v5 }
 0x1a4   :  { %v439_v9 = vadd.f32 %v438_v6, %v424_v8  ;;  %1418 = vmatprep.subr.bf16.mxu1 %v1644_v25  ;;  %1442 = vmatprep.subr.bf16.mxu0 %v1644_v25 }
 0x1a7   :  { %v1244_v11 = vpop.f32.mrb[10].mxu1 }
 0x1a8   :  { %v1764_v12 = vpop.f32.mrb[11].mxu1  ;;  %v426_v19 = vsel %vm410_vm12, %v1244_v11, 0.0 }
 0x1a9   :  { %v1767_v13 = vmul.f32 0.022727273, %v1764_v12  ;;  %v1770_v14 = vpack.c.bf16 %v1244_v11, %v1764_v12  ;;  %v425_v15 = vsel %vm409_vm11, %v1764_v12, 0.0 }
 0x1aa   :  { %v440_v18 = vadd.f32 %v439_v9, %v425_v15 }
 0x1ab   :  { %v469_v20 = vmul.f32 44.0, %v1767_v13  ;;  %1420 = vmatpush3.bf16.msra.mxu1 %v1770_v14  ;;  %1444 = vmatpush3.bf16.msra.mxu0 %v1770_v14  ;;  %v1806_v62 = vmul.f32 %v1802_v59, %v1767_v13 }
 0x1ac   :  { %v441_v21 = vadd.f32 %v440_v18, %v426_v19  ;;  %1421 = vmatprep.subr.bf16.mxu1 %v1644_v25  ;;  %1445 = vmatprep.subr.bf16.mxu0 %v1644_v25 }
 0x1ad   :  { %v470_v22 = vmul.f32 %v469_v20, %v1767_v13  ;;  %v1809_v0 = vmul.f32 44.0, %v1806_v62 }
 0x1af   :  { %v472_v23 = vrot.slane %v470_v22, 1  ;;  %v1247_v24 = vpop.f32.mrb[12].mxu1  ;;  %v454_v2 = vmul.f32 %v1809_v0, %v1806_v62 }
 0x1b0   :  { %v289_v26 = vpop.f32.mrb[13].mxu1  ;;  %v428_v30 = vsel %vm412_vm13, %v1247_v24, 0.0 }
 0x1b1   :  { %v474_v27 = vsub.f32 %v1764_v12, %v472_v23  ;;  %v427_v31 = vsel %vm411_vm14, %v289_v26, 0.0  ;;  %v1784_v32 = vpack.c.bf16 %v1247_v24, %v289_v26 }
 0x1b2   :  { %v442_v33 = vadd.f32 %v441_v21, %v427_v31 }
 0x1b3   :  { %v475_v37 = vmul.f32 0.023255814, %v474_v27  ;;  %1423 = vmatpush3.bf16.msra.mxu1 %v1784_v32  ;;  %1447 = vmatpush3.bf16.msra.mxu0 %v1784_v32 }
 0x1b4   :  { %v443_v38 = vadd.f32 %v442_v33, %v428_v30  ;;  %1424 = vmatprep.subr.bf16.mxu1 %v1644_v25  ;;  %1448 = vmatprep.subr.bf16.mxu0 %v1644_v25 }
 0x1b5   :  { %v476_v39 = vmax.f32 %v475_v37, 0.0 }
 0x1b7   :  { %v1250_v40 = vpop.f32.mrb[14].mxu1  ;;  %1542 = vrsqrt.f32 %v476_v39  ;;  %vm479_vm1 = vcmp.eq.f32.partialorder %v476_v39, inf  ;;  %v482_v49 = vand.u32 2147483648, %v476_v39  ;;  %vm481_vm2 = vcmp.eq.f32.partialorder %v476_v39, 0.0 }
 0x1b8   :  { %v299_v41 = vpop.f32.mrb[15].mxu1  ;;  %v430_v43 = vsel %vm414_vm15, %v1250_v40, 0.0 }
 0x1b9   :  { %v429_v28 = vsel %vm413_vm0, %v299_v41, 0.0  ;;  %v1794_v44 = vpack.c.bf16 %v1250_v40, %v299_v41 }
 0x1ba   :  { %v444_v45 = vadd.f32 %v443_v38, %v429_v28 }
 0x1bb   :  { %1426 = vmatpush3.bf16.msra.mxu1 %v1794_v44  ;;  %1450 = vmatpush3.bf16.msra.mxu0 %v1794_v44 }
 0x1bc   :  { %v445_v46 = vadd.f32 %v444_v45, %v430_v43  ;;  %1451 = vmatprep.subr.bf16.mxu1 %v1644_v25  ;;  %1475 = vmatprep.subr.bf16.mxu0 %v1644_v25 }
 0x1be   :  { %v446_v54 = vrot.slane %v445_v46, 4 }
 0x1c0   :  { %v447_v55 = vadd.f32 %v446_v54, %v445_v46 }
 0x1c1   :  { %v1543_v47 = vpop.eup %1542 }
 0x1c2   :  { %v478_v48 = vmul.f32 %v1543_v47, %v476_v39  ;;  %v448_v56 = vrot.slane %v447_v55, 2 }
 0x1c4   :  { %v480_v50 = vsel %vm479_vm1, %v476_v39, %v478_v48  ;;  %v449_v57 = vadd.f32 %v448_v56, %v447_v55 }
 0x1c5   :  { %v483_v52 = vsel %vm481_vm2, %v482_v49, %v480_v50 }
 0x1c6   :  { %vm484_vm3 = vcmp.eq.f32.partialorder %v483_v52, 0.0  ;;  %v450_v61 = vrot.slane %v449_v57, 1 }
 0x1c7   :  { %v485_v53 = vsel %vm484_vm3, 1.0, %v483_v52 }
 0x1c8   :  { %503 = vperm.xlu1 %1540, %v485_v53   ;;  %v451_v63 = vadd.f32 %v450_v61, %v449_v57 }
 0x1ca   :  { %v452_v1 = vmul.f32 %v1802_v59, %v451_v63 }
 0x1cc   :  { %488 = vperm.xlu1 %1540, %v469_v20   ;;  %v455_v29 = vsub.f32 %v452_v1, %v454_v2 }
 0x1ce   :  { %v456_v3 = vmul.f32 0.023255814, %v455_v29 }
 0x1d0   :  { %v457_v4 = vmax.f32 %v456_v3, 0.0 }
 0x1d2   :  { %1544 = vrsqrt.f32 %v457_v4  ;;  %vm460_vm5 = vcmp.eq.f32.partialorder %v457_v4, inf  ;;  %v463_v9 = vand.u32 2147483648, %v457_v4  ;;  %vm462_vm6 = vcmp.eq.f32.partialorder %v457_v4, 0.0 }
 0x1dc   :  { %v1545_v6 = vpop.eup %1544 }
 0x1dd   :  { %v459_v7 = vmul.f32 %v1545_v6, %v457_v4 }
 0x1df   :  { %v461_v8 = vsel %vm460_vm5, %v457_v4, %v459_v7 }
 0x1e0   :  { %v464_v10 = vsel %vm462_vm6, %v463_v9, %v461_v8 }
 0x1e1   :  { %vm465_vm7 = vcmp.eq.f32.partialorder %v464_v10, 0.0 }
 0x1e2   :  { %v466_v11 = vsel %vm465_vm7, 1.0, %v464_v10 }
 0x1e3   :  { %1546 = vrcp.f32 %v466_v11 }
 0x1ed   :  { %v1547_v18 = vpop.eup %1546 }
 0x1ee   :  { %v1819_v21 = vrot.slane %v1547_v18, 1 }
 0x247   :  { %v1814_v15 = vpop.permute.xlu1 %503 }
 0x248   :  { %1548 = vrcp.f32 %v1814_v15 }
 0x24b   :  { %v489_v16 = vpop.permute.xlu1 %488 }
 0x24c   :  { %v491_v17 = vmul.f32 %v489_v16, %v1806_v62 }
 0x24e   :  { %v493_v19 = vrot.slane %v491_v17, 1 }
 0x250   :  { %v495_v20 = vsub.f32 %v1764_v12, %v493_v19 }
 0x252   :  { %v499_v22 = vmul.f32 %v1819_v21, %v495_v20  ;;  %v1549_v24 = vpop.eup %1548 }
 0x254   :  { %v500_v23 = vmul.f32 %v1802_v59, %v499_v22 }
 0x256   :  { %v1823_v26 = vmul.f32 %v1549_v24, %v500_v23 }
 0x258   :  { %v508_v27 = vmul.f32 %v1823_v26, %v1823_v26 }
 0x25a   :  { %v510_v30 = vsel %vm509_vm8, %v508_v27, 0.0 }
 0x25b   :  { %511 = vadd.xlane.f32.xlu1 %v510_v30 }
 0x2e8   :  { %v512_v12 = vpop.xlane.xlu1 %511 }
 0x2e9   :  { %v513_v31 = vrot.slane %v512_v12, 4 }
 0x2eb   :  { %v514_v33 = vadd.f32 %v513_v31, %v512_v12 }
 0x2ed   :  { %v515_v34 = vrot.slane %v514_v33, 2 }
 0x2ef   :  { %v516_v36 = vadd.f32 %v515_v34, %v514_v33 }
 0x2f1   :  { %v517_v37 = vrot.slane %v516_v36, 1 }
 0x2f3   :  { %v518_v38 = vadd.f32 %v517_v37, %v516_v36 }
 0x2f5   :  { %1499 = vpush %v518_v38 }
 0x326   :  { %s1500_s1 = spop %1499 }
 0x327   :  { %v520_v39 = vstv %s1500_s1 }
 0x328   :  { %1550 = vrsqrt.f32 %v520_v39  ;;  %vm523_vm10 = vcmp.eq.f32.partialorder %v520_v39, inf  ;;  %v526_v43 = vand.u32 2147483648, %v520_v39  ;;  %vm525_vm11 = vcmp.eq.f32.partialorder %v520_v39, 0.0 }
 0x332   :  { %v1551_v40 = vpop.eup %1550 }
 0x333   :  { %v522_v41 = vmul.f32 %v1551_v40, %v520_v39 }
 0x335   :  { %v524_v28 = vsel %vm523_vm10, %v520_v39, %v522_v41 }
 0x336   :  { %v527_v45 = vsel %vm525_vm11, %v526_v43, %v524_v28 }
 0x337   :  { %v528_v46 = vadd.f32 1.1920929e-07, %v527_v45 }
 0x339   :  { %1552 = vrcp.f32 %v528_v46 }
 0x343   :  { %v1553_v47 = vpop.eup %1552 }
 0x344   :  { %v1833_v48 = vmul.f32 %v1553_v47, %v1823_v26 }
 0x346   :  { %v531_v49 = vmul.f32 %v1833_v48, %v1819_v21  ;;  %v641_v4 = vmul.f32 %v1833_v48, %v1823_v26 }
 0x348   :  { %1284 = vmatmul.mubr.f32.vlgmr.msra.gmra.mrb[16].mxu1 %v531_v49  ;;  %v603_v50 = vrot.slane %v531_v49, 7  ;;  %v642_v6 = vsel %vm509_vm8, %v641_v4, 0.0 }
 0x349   :  { %1453 = vmatpush3.bf16.msra.mxu1 %v1714_v35  ;;  %1353 = vmatprep.mubr.msk.f32.mxu1 %vm1647_vm9, %v1646_v58 }
 0x34a   :  { %1454 = vmatprep.subr.bf16.mxu1 %v1644_v25  ;;  %v605_v52 = vmul.f32 %v603_v50, %v1806_v62 }
 0x34c   :  { %v607_v53 = vrot.slane %v605_v52, 1 }
 0x34d   :  { %1456 = vmatpush3.bf16.msra.mxu1 %v1724_v42 }
 0x34e   :  { %v609_v54 = vsel %vm509_vm8, %v607_v53, 0.0  ;;  %1457 = vmatprep.subr.bf16.mxu1 %v1644_v25 }
 0x34f   :  { %610 = vadd.xlane.f32.xlu0 %v609_v54 }
 0x351   :  { %1459 = vmatpush3.bf16.msra.mxu1 %v1734_v51 }
 0x352   :  { %1460 = vmatprep.subr.bf16.mxu1 %v1644_v25 }
 0x355   :  { %1462 = vmatpush3.bf16.msra.mxu1 %v1744_v60 }
 0x356   :  { %1463 = vmatprep.subr.bf16.mxu1 %v1644_v25 }
 0x359   :  { %1465 = vmatpush3.bf16.msra.mxu1 %v1754_v5 }
 0x35a   :  { %1466 = vmatprep.subr.bf16.mxu1 %v1644_v25 }
 0x35d   :  { %1468 = vmatpush3.bf16.msra.mxu1 %v1770_v14 }
 0x35e   :  { %1469 = vmatprep.subr.bf16.mxu1 %v1644_v25 }
 0x361   :  { %1471 = vmatpush3.bf16.msra.mxu1 %v1784_v32 }
 0x362   :  { %1472 = vmatprep.subr.bf16.mxu1 %v1644_v25 }
 0x365   :  { %1474 = vmatpush3.bf16.msra.mxu1 %v1794_v44 }
 0x3dc   :  { %v611_v35 = vpop.xlane.xlu0 %610 }
 0x3dd   :  { %v612_v42 = vrot.slane %v611_v35, 4 }
 0x3df   :  { %v613_v51 = vadd.f32 %v612_v42, %v611_v35 }
 0x3e1   :  { %v614_v60 = vrot.slane %v613_v51, 2 }
 0x3e3   :  { %v615_v55 = vadd.f32 %v614_v60, %v613_v51 }
 0x3e5   :  { %v616_v56 = vrot.slane %v615_v55, 1 }
 0x3e7   :  { %v617_v57 = vadd.f32 %v616_v56, %v615_v55 }
 0x3e9   :  { %1501 = vpush %v617_v57 }
 0x41a   :  { %s1502_s6 = spop %1501 }
 0x41b   :  { %v619_v5 = vstv %s1502_s6  ;;  %v598_v61 = vpop.f32.mrb[16].mxu1 }
 0x41c   :  { %v620_v14 = vmul.f32 %v619_v5, %v1809_v0  ;;  %v1285_v63 = vpop.f32.mrb[17].mxu1 }
 0x41e   :  { %v622_v1 = vrot.slane %v620_v14, 1 }
 0x420   :  { %v624_v32 = vsub.f32 %v598_v61, %v622_v1 }
 0x422   :  { %v625_v2 = vmul.f32 %v624_v32, %v1819_v21 }
 0x424   :  { %v626_v44 = vmul.f32 %v1802_v59, %v625_v2 }
 0x426   :  { %v627_v29 = vmul.f32 %v626_v44, %v1833_v48 }
 0x428   :  { %v628_v3 = vsel %vm509_vm8, %v627_v29, 0.0 }
 0x429   :  { %629 = vadd.xlane.f32.xlu1 %v628_v3 }
 0x42d   :  { %643 = vadd.xlane.f32.xlu1 %v642_v6 }
 0x4b6   :  { %v630_v7 = vpop.xlane.xlu1 %629 }
 0x4b7   :  { %v631_v8 = vrot.slane %v630_v7, 4 }
 0x4b9   :  { %v632_v9 = vadd.f32 %v631_v8, %v630_v7 }
 0x4ba   :  { %v644_v10 = vpop.xlane.xlu1 %643 }
 0x4bb   :  { %v633_v11 = vrot.slane %v632_v9, 2  ;;  %v645_v16 = vrot.slane %v644_v10, 4 }
 0x4bd   :  { %v646_v17 = vadd.f32 %v645_v16, %v644_v10  ;;  %v634_v18 = vadd.f32 %v633_v11, %v632_v9 }
 0x4bf   :  { %v647_v19 = vrot.slane %v646_v17, 2  ;;  %v635_v20 = vrot.slane %v634_v18, 1 }
 0x4c1   :  { %v636_v22 = vadd.f32 %v635_v20, %v634_v18  ;;  %v648_v23 = vadd.f32 %v647_v19, %v646_v17 }
 0x4c3   :  { %1503 = vpush %v636_v22  ;;  %v649_v24 = vrot.slane %v648_v23, 1 }
 0x4c5   :  { %v650_v27 = vadd.f32 %v649_v24, %v648_v23 }
 0x4c7   :  { %1505 = vpush %v650_v27 }
 0x4f4   :  { %s1504_s7 = spop %1503 }
 0x4f5   :  { %v638_v30 = vstv %s1504_s7 }
 0x4f6   :  { %1554 = vrcp.f32 %v638_v30 }
 0x4f8   :  { %s1506_s8 = spop %1505 }
 0x4f9   :  { %v652_v31 = vstv %s1506_s8 }
 0x500   :  { %v1555_v12 = vpop.eup %1554 }
 0x501   :  { %v1864_v33 = vmul.f32 %v1555_v12, %v652_v31  ;;  %v1866_v34 = vmul.f32 %v1555_v12, %v626_v44 }
 0x503   :  { %v654_v36 = vmul.f32 %v1864_v33, %v638_v30 }
 0x505   :  { %v655_v37 = vmul.f32 %v654_v36, %v1866_v34 }
 0x507   :  { %v1871_v38 = vsub.f32 %v1823_v26, %v655_v37 }
 0x509   :  { %v659_v39 = vmul.f32 %v1871_v38, %v1871_v38 }
 0x50b   :  { %v660_v40 = vsel %vm509_vm8, %v659_v39, 0.0 }
 0x50c   :  { %661 = vadd.xlane.f32.xlu1 %v660_v40 }
 0x599   :  { %v662_v41 = vpop.xlane.xlu1 %661 }
 0x59a   :  { %v663_v43 = vrot.slane %v662_v41, 4 }
 0x59c   :  { %v664_v28 = vadd.f32 %v663_v43, %v662_v41 }
 0x59e   :  { %v665_v45 = vrot.slane %v664_v28, 2 }
 0x5a0   :  { %v666_v46 = vadd.f32 %v665_v45, %v664_v28 }
 0x5a2   :  { %v667_v47 = vrot.slane %v666_v46, 1 }
 0x5a4   :  { %v668_v49 = vadd.f32 %v667_v47, %v666_v46 }
 0x5a6   :  { %1507 = vpush %v668_v49 }
 0x5d7   :  { %s1508_s9 = spop %1507 }
 0x5d8   :  { %v670_v50 = vstv %s1508_s9 }
 0x5d9   :  { %1556 = vrsqrt.f32 %v670_v50  ;;  %vm673_vm12 = vcmp.eq.f32.partialorder %v670_v50, inf  ;;  %v676_v53 = vand.u32 2147483648, %v670_v50  ;;  %vm675_vm13 = vcmp.eq.f32.partialorder %v670_v50, 0.0 }
 0x5e3   :  { %v1557_v52 = vpop.eup %1556 }
 0x5e4   :  { %v672_v26 = vmul.f32 %v1557_v52, %v670_v50 }
 0x5e6   :  { %v674_v54 = vsel %vm673_vm12, %v670_v50, %v672_v26 }
 0x5e7   :  { %v677_v35 = vsel %vm675_vm13, %v676_v53, %v674_v54 }
 0x5e8   :  { %v678_v42 = vadd.f32 1.1920929e-07, %v677_v35 }
 0x5ea   :  { %1558 = vrcp.f32 %v678_v42 }
 0x5f4   :  { %v1559_v51 = vpop.eup %1558 }
 0x5f5   :  { %v680_v60 = vmul.f32 %v1559_v51, %v1871_v38 }
 0x5f7   :  { %v681_v55 = vmul.f32 %v680_v60, %v1866_v34 }
 0x5f9   :  { %v682_v56 = vsel %vm509_vm8, %v681_v55, 0.0 }
 0x5fa   :  { %683 = vadd.xlane.f32.xlu1 %v682_v56  ;;  %v657_v56 = vmul.f32 %v1864_v33, %v1833_v48 }
 0x687   :  { %v684_v57 = vpop.xlane.xlu1 %683 }
 0x688   :  { %v685_v5 = vrot.slane %v684_v57, 4 }
 0x68a   :  { %v686_v61 = vadd.f32 %v685_v5, %v684_v57 }
 0x68c   :  { %v687_v14 = vrot.slane %v686_v61, 2 }
 0x68e   :  { %v688_v63 = vadd.f32 %v687_v14, %v686_v61 }
 0x690   :  { %v689_v1 = vrot.slane %v688_v63, 1 }
 0x692   :  { %v690_v32 = vadd.f32 %v689_v1, %v688_v63 }
 0x694   :  { %1509 = vpush %v690_v32 }
 0x6c5   :  { %s1510_s10 = spop %1509 }
 0x6c6   :  { %v692_v2 = vstv %s1510_s10 }
 0x6c7   :  { %v693_v44 = vmul.f32 %v692_v2, %v1833_v48 }
 0x6c9   :  { %v1880_v29 = vsub.f32 %v680_v60, %v693_v44 }
 0x6cb   :  { %v695_v3 = vmul.f32 %v1880_v29, %v1819_v21  ;;  %v805_v37 = vmul.f32 %v1880_v29, %v1871_v38 }
 0x6cd   :  { %1319 = vmatmul.mubr.f32.vlgmr.msra.gmra.mrb[0].mxu0 %v695_v3  ;;  %v767_v4 = vrot.slane %v695_v3, 7  ;;  %v806_v39 = vsel %vm509_vm8, %v805_v37, 0.0 }
 0x6ce   :  { %1388 = vmatprep.mubr.msk.f32.mxu0 %vm1647_vm9, %v1646_v58 }
 0x6cf   :  { %v769_v6 = vmul.f32 %v767_v4, %v1806_v62 }
 0x6d1   :  { %v771_v7 = vrot.slane %v769_v6, 1 }
 0x6d3   :  { %v773_v8 = vsel %vm509_vm8, %v771_v7, 0.0 }
 0x6d4   :  { %774 = vadd.xlane.f32.xlu1 %v773_v8 }
 0x761   :  { %v775_v9 = vpop.xlane.xlu1 %774 }
 0x762   :  { %v776_v10 = vrot.slane %v775_v9, 4 }
 0x764   :  { %v777_v11 = vadd.f32 %v776_v10, %v775_v9 }
 0x766   :  { %v778_v16 = vrot.slane %v777_v11, 2 }
 0x768   :  { %v779_v17 = vadd.f32 %v778_v16, %v777_v11 }
 0x76a   :  { %v780_v18 = vrot.slane %v779_v17, 1 }
 0x76c   :  { %v781_v19 = vadd.f32 %v780_v18, %v779_v17 }
 0x76e   :  { %1511 = vpush %v781_v19 }
 0x79f   :  { %s1512_s11 = spop %1511 }
 0x7a0   :  { %v783_v20 = vstv %s1512_s11  ;;  %v762_v22 = vpop.f32.mrb[0].mxu0 }
 0x7a1   :  { %v784_v23 = vmul.f32 %v783_v20, %v1809_v0  ;;  %v1320_v58 = vpop.f32.mrb[1].mxu0 }
 0x7a3   :  { %v786_v24 = vrot.slane %v784_v23, 1 }
 0x7a5   :  { %v788_v27 = vsub.f32 %v762_v22, %v786_v24 }
 0x7a7   :  { %v789_v30 = vmul.f32 %v788_v27, %v1819_v21 }
 0x7a9   :  { %v790_v12 = vmul.f32 %v1802_v59, %v789_v30 }
 0x7ab   :  { %v791_v31 = vmul.f32 %v790_v12, %v1880_v29 }
 0x7ad   :  { %v792_v36 = vsel %vm509_vm8, %v791_v31, 0.0 }
 0x7ae   :  { %793 = vadd.xlane.f32.xlu1 %v792_v36 }
 0x7b2   :  { %807 = vadd.xlane.f32.xlu1 %v806_v39 }
 0x83b   :  { %v794_v40 = vpop.xlane.xlu1 %793 }
 0x83c   :  { %v795_v41 = vrot.slane %v794_v40, 4 }
 0x83e   :  { %v796_v43 = vadd.f32 %v795_v41, %v794_v40 }
 0x83f   :  { %v808_v28 = vpop.xlane.xlu1 %807 }
 0x840   :  { %v797_v45 = vrot.slane %v796_v43, 2  ;;  %v809_v46 = vrot.slane %v808_v28, 4 }
 0x842   :  { %v810_v47 = vadd.f32 %v809_v46, %v808_v28  ;;  %v798_v49 = vadd.f32 %v797_v45, %v796_v43 }
 0x844   :  { %v811_v50 = vrot.slane %v810_v47, 2  ;;  %v799_v52 = vrot.slane %v798_v49, 1 }
 0x846   :  { %v800_v26 = vadd.f32 %v799_v52, %v798_v49  ;;  %v812_v53 = vadd.f32 %v811_v50, %v810_v47 }
 0x848   :  { %1513 = vpush %v800_v26  ;;  %v813_v54 = vrot.slane %v812_v53, 1 }
 0x84a   :  { %v814_v35 = vadd.f32 %v813_v54, %v812_v53 }
 0x84c   :  { %1515 = vpush %v814_v35 }
 0x879   :  { %s1514_s12 = spop %1513 }
 0x87a   :  { %v802_v42 = vstv %s1514_s12 }
 0x87b   :  { %1560 = vrcp.f32 %v802_v42 }
 0x87d   :  { %s1516_s13 = spop %1515 }
 0x87e   :  { %v816_v60 = vstv %s1516_s13 }
 0x885   :  { %v1561_v51 = vpop.eup %1560 }
 0x886   :  { %v817_v55 = vmul.f32 %v1561_v51, %v816_v60  ;;  %v804_v57 = vmul.f32 %v1561_v51, %v790_v12 }
 0x888   :  { %v818_v5 = vmul.f32 %v817_v55, %v802_v42  ;;  %v821_v61 = vmul.f32 %v817_v55, %v1880_v29 }
 0x88a   :  { %v819_v14 = vmul.f32 %v818_v5, %v804_v57  ;;  %v1899_v63 = vadd.f32 %v821_v61, %v657_v56 }
 0x88c   :  { %v1902_v1 = vsub.f32 %v1871_v38, %v819_v14 }
 0x88e   :  { %v823_v32 = vmul.f32 %v1902_v1, %v1902_v1 }
 0x890   :  { %v824_v2 = vsel %vm509_vm8, %v823_v32, 0.0 }
 0x891   :  { %825 = vadd.xlane.f32.xlu1 %v824_v2 }
 0x91e   :  { %v826_v44 = vpop.xlane.xlu1 %825 }
 0x91f   :  { %v827_v3 = vrot.slane %v826_v44, 4 }
 0x921   :  { %v828_v4 = vadd.f32 %v827_v3, %v826_v44 }
 0x923   :  { %v829_v33 = vrot.slane %v828_v4, 2 }
 0x925   :  { %v830_v6 = vadd.f32 %v829_v33, %v828_v4 }
 0x927   :  { %v831_v7 = vrot.slane %v830_v6, 1 }
 0x929   :  { %v832_v8 = vadd.f32 %v831_v7, %v830_v6 }
 0x92b   :  { %1517 = vpush %v832_v8 }
 0x95c   :  { %s1518_s14 = spop %1517 }
 0x95d   :  { %v834_v9 = vstv %s1518_s14 }
 0x95e   :  { %1562 = vrsqrt.f32 %v834_v9  ;;  %vm837_vm14 = vcmp.eq.f32.partialorder %v834_v9, inf  ;;  %v840_v11 = vand.u32 2147483648, %v834_v9  ;;  %vm839_vm15 = vcmp.eq.f32.partialorder %v834_v9, 0.0 }
 0x968   :  { %v1563_v10 = vpop.eup %1562 }
 0x969   :  { %v836_v38 = vmul.f32 %v1563_v10, %v834_v9 }
 0x96b   :  { %v838_v16 = vsel %vm837_vm14, %v834_v9, %v836_v38  ;;  %v359_v38 = vld [vmem:[#allocation6] sm:$0xff] }
 0x96c   :  { %v841_v17 = vsel %vm839_vm15, %v840_v11, %v838_v16  ;;  %v361_v16 = vld [vmem:[#allocation6 + $0x10] sm:$0xff] }
 0x96d   :  { %v842_v18 = vadd.f32 1.1920929e-07, %v841_v17  ;;  %v362_v17 = vld [vmem:[#allocation6 + $0x18] sm:$0xff] }
 0x96f   :  { %1564 = vrcp.f32 %v842_v18  ;;  %v363_v18 = vld [vmem:[#allocation6 + $0x20] sm:$0xff] }
 0x979   :  { %v1565_v19 = vpop.eup %1564 }
 0x97a   :  { %v844_v20 = vmul.f32 %v1565_v19, %v1902_v1  ;;  %v364_v19 = vld [vmem:[#allocation6 + $0x28] sm:$0xff] }
 0x97c   :  { %v845_v22 = vmul.f32 %v844_v20, %v1866_v34  ;;  %v859_v58 = vmul.f32 %v844_v20, %v804_v57 }
 0x97e   :  { %v846_v23 = vsel %vm509_vm8, %v845_v22, 0.0  ;;  %v860_v24 = vsel %vm509_vm8, %v859_v58, 0.0  ;;  %v366_v22 = vld [vmem:[#allocation6 + $0x38] sm:$0xff]  ;;  %v367_v58 = vld [vmem:[#allocation6 + $0x40] sm:$0xff] }
 0x97f   :  { %847 = vadd.xlane.f32.xlu1 %v846_v23 }
 0x983   :  { %861 = vadd.xlane.f32.xlu1 %v860_v24  ;;  %v368_v24 = vld [vmem:[#allocation6 + $0x48] sm:$0xff] }
 0xa0c   :  { %v848_v27 = vpop.xlane.xlu1 %847 }
 0xa0d   :  { %v849_v30 = vrot.slane %v848_v27, 4 }
 0xa0f   :  { %v850_v12 = vadd.f32 %v849_v30, %v848_v27  ;;  %v1488_v27 = vpack.c.bf16 %v368_v24, %v367_v58  ;;  %v369_v30 = vld [vmem:[#allocation6 + $0x50] sm:$0xff] }
 0xa10   :  { %v862_v31 = vpop.xlane.xlu1 %861 }
 0xa11   :  { %v851_v36 = vrot.slane %v850_v12, 2  ;;  %v863_v37 = vrot.slane %v862_v31, 4 }
 0xa13   :  { %v864_v39 = vadd.f32 %v863_v37, %v862_v31  ;;  %v852_v40 = vadd.f32 %v851_v36, %v850_v12  ;;  %v370_v12 = vld [vmem:[#allocation6 + $0x58] sm:$0xff]  ;;  %v371_v36 = vld [vmem:[#allocation6 + $0x60] sm:$0xff]  ;;  %v372_v37 = vld [vmem:[#allocation6 + $0x68] sm:$0xff] }
 0xa14   :  { %v1491_v31 = vpack.c.bf16 %v370_v12, %v369_v30 }
 0xa15   :  { %v865_v41 = vrot.slane %v864_v39, 2  ;;  %v853_v43 = vrot.slane %v852_v40, 1 }
 0xa17   :  { %v854_v28 = vadd.f32 %v853_v43, %v852_v40  ;;  %v866_v45 = vadd.f32 %v865_v41, %v864_v39  ;;  %v1494_v39 = vpack.c.bf16 %v372_v37, %v371_v36  ;;  %v373_v40 = vld [vmem:[#allocation6 + $0x70] sm:$0xff]  ;;  %v374_v41 = vld [vmem:[#allocation6 + $0x78] sm:$0xff] }
 0xa18   :  { %v1497_v43 = vpack.c.bf16 %v374_v41, %v373_v40 }
 0xa19   :  { %1519 = vpush %v854_v28  ;;  %v867_v34 = vrot.slane %v866_v45, 1 }
 0xa1b   :  { %v868_v46 = vadd.f32 %v867_v34, %v866_v45 }
 0xa1d   :  { %1521 = vpush %v868_v46 }
 0xa4a   :  { %s1520_s15 = spop %1519 }
 0xa4b   :  { %v856_v47 = vstv %s1520_s15 }
 0xa4c   :  { %v857_v49 = vmul.f32 %v856_v47, %v1833_v48 }
 0xa4e   :  { %s1522_s16 = spop %1521  ;;  %v858_v52 = vsub.f32 %v844_v20, %v857_v49  ;;  %v1482_v20 = vpack.c.bf16 %v364_v19, %v363_v18 }
 0xa4f   :  { %v870_v50 = vstv %s1522_s16 }
 0xa50   :  { %v871_v26 = vmul.f32 %v870_v50, %v1880_v29 }
 0xa52   :  { %v1913_v53 = vsub.f32 %v858_v52, %v871_v26 }
 0xa54   :  { %v873_v54 = vmul.f32 %v1913_v53, %v1819_v21  ;;  %v981_v9 = vmul.f32 %v1913_v53, %v1902_v1  ;;  %v365_v1 = vld [vmem:[#allocation6 + $0x30] sm:$0xff] }
 0xa55   :  { %v1485_v23 = vpack.c.bf16 %v366_v22, %v365_v1 }
 0xa56   :  { %1354 = vmatmul.mubr.f32.vlgmr.msra.gmra.mrb[18].mxu1 %v873_v54  ;;  %v945_v35 = vrot.slane %v873_v54, 7  ;;  %v982_v10 = vsel %vm509_vm8, %v981_v9, 0.0 }
 0xa58   :  { %v947_v42 = vmul.f32 %v945_v35, %v1806_v62 }
 0xa5a   :  { %v949_v51 = vrot.slane %v947_v42, 1 }
 0xa5c   :  { %v951_v60 = vsel %vm509_vm8, %v949_v51, 0.0 }
 0xa5d   :  { %952 = vadd.xlane.f32.xlu1 %v951_v60 }
 0xaea   :  { %v953_v55 = vpop.xlane.xlu1 %952 }
 0xaeb   :  { %v954_v48 = vrot.slane %v953_v55, 4 }
 0xaed   :  { %v955_v56 = vadd.f32 %v954_v48, %v953_v55 }
 0xaef   :  { %v956_v57 = vrot.slane %v955_v56, 2 }
 0xaf1   :  { %v957_v5 = vadd.f32 %v956_v57, %v955_v56 }
 0xaf3   :  { %v958_v61 = vrot.slane %v957_v5, 1 }
 0xaf5   :  { %v959_v29 = vadd.f32 %v958_v61, %v957_v5 }
 0xaf7   :  { %1523 = vpush %v959_v29 }
 0xb28   :  { %s1524_s17 = spop %1523 }
 0xb29   :  { %v961_v14 = vstv %s1524_s17  ;;  %v940_v32 = vpop.f32.mrb[18].mxu1 }
 0xb2a   :  { %v962_v2 = vmul.f32 %v961_v14, %v1809_v0  ;;  %v1355_v44 = vpop.f32.mrb[19].mxu1  ;;  %v360_v0 = vld [vmem:[#allocation6 + $0x8] sm:$0xff]  ;;  %v1000_v14 = vrot.slane %v1806_v62, 1 }
 0xb2b   :  { %v1476_v11 = vpack.c.bf16 %v360_v0, %v359_v38 }
 0xb2c   :  { %v964_v3 = vrot.slane %v962_v2, 1 }
 0xb2d   :  { %1477 = vmatpush3.bf16.xpose.msra.mxu0 %v1476_v11 }
 0xb2e   :  { %v966_v4 = vsub.f32 %v940_v32, %v964_v3  ;;  %1478 = vmatprep.subr.bf16.mxu0 %v1644_v25 }
 0xb30   :  { %v967_v33 = vmul.f32 %v966_v4, %v1819_v21 }
 0xb32   :  { %v968_v6 = vmul.f32 %v1802_v59, %v967_v33  ;;  %v1479_v59 = vpack.c.bf16 %v362_v17, %v361_v16 }
 0xb34   :  { %v969_v7 = vmul.f32 %v968_v6, %v1913_v53 }
 0xb35   :  { %1480 = vmatpush3.bf16.xpose.msra.mxu0 %v1479_v59 }
 0xb36   :  { %v970_v8 = vsel %vm509_vm8, %v969_v7, 0.0  ;;  %1481 = vmatprep.subr.bf16.mxu0 %v1644_v25 }
 0xb37   :  { %971 = vadd.xlane.f32.xlu1 %v970_v8 }
 0xb3b   :  { %983 = vadd.xlane.f32.xlu1 %v982_v10 }
 0xb3d   :  { %1483 = vmatpush3.bf16.xpose.msra.mxu0 %v1482_v20 }
 0xb3e   :  { %1484 = vmatprep.subr.bf16.mxu0 %v1644_v25 }
 0xb45   :  { %1486 = vmatpush3.bf16.xpose.msra.mxu0 %v1485_v23 }
 0xb46   :  { %1487 = vmatprep.subr.bf16.mxu0 %v1644_v25 }
 0xb4d   :  { %1489 = vmatpush3.bf16.xpose.msra.mxu0 %v1488_v27 }
 0xb4e   :  { %1490 = vmatprep.subr.bf16.mxu0 %v1644_v25 }
 0xb55   :  { %1492 = vmatpush3.bf16.xpose.msra.mxu0 %v1491_v31 }
 0xb56   :  { %1493 = vmatprep.subr.bf16.mxu0 %v1644_v25 }
 0xb5d   :  { %1495 = vmatpush3.bf16.xpose.msra.mxu0 %v1494_v39 }
 0xb5e   :  { %1496 = vmatprep.subr.bf16.mxu0 %v1644_v25 }
 0xb65   :  { %1498 = vmatpush3.bf16.xpose.msra.mxu0 %v1497_v43 }
 0xbc4   :  { %v972_v28 = vpop.xlane.xlu1 %971 }
 0xbc5   :  { %v973_v45 = vrot.slane %v972_v28, 4 }
 0xbc7   :  { %v974_v34 = vadd.f32 %v973_v45, %v972_v28 }
 0xbc8   :  { %v984_v46 = vpop.xlane.xlu1 %983 }
 0xbc9   :  { %v975_v47 = vrot.slane %v974_v34, 2  ;;  %v985_v49 = vrot.slane %v984_v46, 4 }
 0xbcb   :  { %v986_v50 = vadd.f32 %v985_v49, %v984_v46  ;;  %v976_v52 = vadd.f32 %v975_v47, %v974_v34 }
 0xbcd   :  { %v987_v26 = vrot.slane %v986_v50, 2  ;;  %v977_v54 = vrot.slane %v976_v52, 1 }
 0xbcf   :  { %v978_v35 = vadd.f32 %v977_v54, %v976_v52  ;;  %v988_v42 = vadd.f32 %v987_v26, %v986_v50 }
 0xbd1   :  { %1525 = vpush %v978_v35  ;;  %v989_v51 = vrot.slane %v988_v42, 1 }
 0xbd3   :  { %v990_v60 = vadd.f32 %v989_v51, %v988_v42 }
 0xbd5   :  { %1527 = vpush %v990_v60 }
 0xc02   :  { %s1526_s18 = spop %1525 }
 0xc03   :  { %v980_v25 = vstv %s1526_s18 }
 0xc04   :  { %1566 = vrcp.f32 %v980_v25 }
 0xc06   :  { %s1528_s19 = spop %1527 }
 0xc07   :  { %v992_v48 = vstv %s1528_s19 }
 0xc0e   :  { %v1567_v55 = vpop.eup %1566 }
 0xc0f   :  { %v994_v56 = vmul.f32 %v1567_v55, %v992_v48 }
 0xc11   :  { %v995_v57 = vmul.f32 %v994_v56, %v1913_v53 }
 0xc13   :  { %v996_v5 = vadd.f32 %v995_v57, %v1899_v63 }
 0xc15   :  { %v997_v61 = vmul.f32 %v996_v5, %v1819_v21 }
 0xc17   :  { %v998_v29 = vmul.f32 %v997_v61, %v1814_v15 }
 0xc19   :  { %1389 = vmatmul.mubr.f32.vlgmr.msra.gmra.mrb[2].mxu0 %v998_v29  ;;  %v1002_v32 = vmul.f32 %v1000_v14, %v998_v29 }
 0xc1b   :  { %v1003_v2 = vsel %vm509_vm8, %v1002_v32, 0.0 }
 0xc1c   :  { %1004 = vadd.xlane.f32.xlu1 %v1003_v2 }
 0xca9   :  { %v1005_v44 = vpop.xlane.xlu1 %1004 }
 0xcaa   :  { %v1006_v3 = vrot.slane %v1005_v44, 4 }
 0xcac   :  { %v1007_v4 = vadd.f32 %v1006_v3, %v1005_v44 }
 0xcae   :  { %v1008_v33 = vrot.slane %v1007_v4, 2 }
 0xcb0   :  { %v1009_v6 = vadd.f32 %v1008_v33, %v1007_v4 }
 0xcb2   :  { %v1010_v7 = vrot.slane %v1009_v6, 1 }
 0xcb4   :  { %v1011_v53 = vadd.f32 %v1010_v7, %v1009_v6 }
 0xcb6   :  { %1529 = vpush %v1011_v53 }
 0xce7   :  { %s1530_s20 = spop %1529 }
 0xce8   :  { %v1013_v63 = vstv %s1530_s20 }
 0xce9   :  { %v1014_v21 = vsub.f32 %v1767_v13, %v1013_v63 }
 0xceb   :  { %1017 = vperm.xlu1 %1540, %v1014_v21  }
 0xcec   :  { %v1087_v15 = vpop.f32.mrb[2].mxu0 }
 0xced   :  { %v1390_v62 = vpop.f32.mrb[3].mxu0 }
 0xd6a   :  { %v1018_v8 = vpop.permute.xlu1 %1017 }
 0xd6b   :  { %v1019_v9 = vrot.slane %v1018_v8, 1 }
 0xd6d   :  { %v1088_v10 = vadd.f32 %v1087_v15, %v1019_v9 }
 0xd6f   :  { %1091 = vst [vmem:[#allocation8] sm:$0x1] %v1088_v10 }
 0xd70   :  { %1623 = shalt.err (!%p1620_p6)
}
 0xd71   :  { %s1624_s27 = scalar_lea.hbm %s1955_s2, 16 }
 0xd72   :  { %p1625_p7 = scmp.ne.s32.totalorder %s1955_s2, %s1624_s27  ;;  %p1628_p8 = scmp.lt.u32.totalorder %s1624_s27, %s1955_s2 }
 0xd74   :  { %p1630_p9 = pnand %p1628_p8, %p1625_p7 }
 0xd76   :  { %1633 = shalt.err (!%p1630_p9)
}
 0xd77   :  { %1101 = dma.vmem_to_hbm [thread:$0]  %s1099_s22, 16, %s1955_s2, [#allocation5]  }
 0xd78   :  { %1638 = dma.done.wait [#allocation5], 16  }
 0xd79   :  { %1639 = vsyncadd [#allocation5], 4294967280 }
 0xd7a   :  { %1105 = vsyncpa [#allocation4], 1 }
 0xd7b   :  { %1106 = vsyncpa [#allocation7], 1 }
 0xd7c   :  { %1107 = vsyncpa [#allocation5], 1 }

</bundles_post_ra>
